<compile_context>
chip_gen: v7x
topology: tpu7x:2x2x1
jax: 0.10.0
libtpu: 0.0.40
codegen_flags: <defaults>
</compile_context>

<pallas_src>
import functools

import jax
import jax.numpy as jnp
from jax.experimental import pallas as pl
from jax.experimental.pallas import tpu as pltpu


def _sigmoid(x):
    # tanh-based sigmoid: numerically stable and lowers to the EUP tanh unit.
    return 0.5 * (jnp.tanh(0.5 * x) + 1.0)


def _round_up(x, m):
    return ((x + m - 1) // m) * m


def _make_rbm_kernel(k: int):
    """Kernel over one batch tile: full CD-k probability chain in VMEM."""

    def kernel(v_ref, rand_ref, w_t_ref, w_ref, hb_ref, vb_ref, pv_ref, vs_ref):
        v = v_ref[...].astype(jnp.float32)
        w_t = w_t_ref[...]            # (n_vis, n_hid)  == W.T
        w = w_ref[...]                # (n_hid, n_vis)  == W (PyTorch layout)
        h_b = hb_ref[...]             # (1, n_hid) -> broadcasts over rows
        v_b = vb_ref[...]             # (1, n_vis)

        # v_to_h on the input
        p_h = _sigmoid(jnp.dot(v, w_t, preferred_element_type=jnp.float32) + h_b)

        p_v = p_h  # overwritten on the first iteration (k >= 1)
        for step in range(k):
            # h_to_v (uses probabilities: use_prob_hid=True)
            p_v = _sigmoid(jnp.dot(p_h, w, preferred_element_type=jnp.float32) + v_b)
            if step + 1 < k:
                # v_to_h (uses probabilities: use_prob_vis=True); the final
                # v_to_h of the PyTorch loop is dead code for the output, skip.
                p_h = _sigmoid(
                    jnp.dot(p_v, w_t, preferred_element_type=jnp.float32) + h_b)

        # sample_from_p: relu(sign(p - rand)) == 1[p > rand]
        rand = rand_ref[...].astype(jnp.float32)
        v_samp = jnp.where(p_v > rand, 1.0, 0.0)

        pv_ref[...] = p_v.astype(pv_ref.dtype)
        vs_ref[...] = v_samp.astype(vs_ref.dtype)

    return kernel


def rbm_forward(v, W, v_bias, h_bias, rand, *, k=5, tile_b=512,
                use_prob_vis=True, use_prob_hid=True):
    """Pallas CD-k forward.  Returns (v, v_sample, p_v_last).

    v: (..., n_vis) visible input; W: (n_hid, n_vis) PyTorch-layout weights;
    rand: uniform(0,1) slab with the same shape as v, used to sample the final
    visible layer.  (v, v_sample) matches RBM.forward's return; p_v_last is the
    deterministic probability map, returned for validation.
    """
    assert k >= 1
    # TODO(synk): use_prob_vis=False / use_prob_hid=False paths would need
    # per-step Bernoulli samples feeding back into the chain (in-kernel
    # pltpu.prng_random_bits); only the module's default flags are implemented.
    assert use_prob_vis and use_prob_hid

    n_hid, n_vis = W.shape
    orig_shape = v.shape
    flat = v.reshape(-1, n_vis)
    rand_flat = rand.reshape(-1, n_vis)
    n = flat.shape[0]

    # Large tiles amortize per-grid-step overhead, but clamp to the 8-rounded
    # batch so small batches are not padded up to a full mega-tile.
    tile_b = max(8, min(tile_b, _round_up(n, 8)))
    n_pad = pl.cdiv(n, tile_b) * tile_b
    if n_pad != n:
        flat = jnp.pad(flat, ((0, n_pad - n), (0, 0)))
        rand_flat = jnp.pad(rand_flat, ((0, n_pad - n), (0, 0)))

    w_t = W.T                                  # transpose once, outside the kernel
    hb = h_bias.reshape(1, n_hid).astype(jnp.float32)
    vb = v_bias.reshape(1, n_vis).astype(jnp.float32)

    p_v, v_samp = pl.pallas_call(
        _make_rbm_kernel(k),
        out_shape=(
            jax.ShapeDtypeStruct((n_pad, n_vis), jnp.float32),
            jax.ShapeDtypeStruct((n_pad, n_vis), v.dtype),
        ),
        grid_spec=pltpu.PrefetchScalarGridSpec(
            num_scalar_prefetch=0,
            grid=(n_pad // tile_b,),
            in_specs=[
                pl.BlockSpec((tile_b, n_vis), lambda i: (i, 0)),   # v tile
                pl.BlockSpec((tile_b, n_vis), lambda i: (i, 0)),   # rand tile
                pl.BlockSpec((n_vis, n_hid), lambda i: (0, 0)),    # W.T (resident)
                pl.BlockSpec((n_hid, n_vis), lambda i: (0, 0)),    # W   (resident)
                pl.BlockSpec((1, n_hid), lambda i: (0, 0)),        # h_bias
                pl.BlockSpec((1, n_vis), lambda i: (0, 0)),        # v_bias
            ],
            out_specs=[
                pl.BlockSpec((tile_b, n_vis), lambda i: (i, 0)),   # p_v
                pl.BlockSpec((tile_b, n_vis), lambda i: (i, 0)),   # v_sample
            ],
        ),
        compiler_params=pltpu.CompilerParams(
            dimension_semantics=("parallel",)),
    )(flat, rand_flat, w_t, W, hb, vb)

    v_samp = v_samp[:n].reshape(orig_shape)
    p_v = p_v[:n].reshape(orig_shape)
    return v, v_samp, p_v


def reference_forward(v, W, v_bias, h_bias, rand, k):
    """Pure-JAX reference of the same CD-k chain (default flags)."""
    n_hid, n_vis = W.shape
    flat = v.reshape(-1, n_vis).astype(jnp.float32)
    p_h = _sigmoid(flat @ W.T + h_bias)
    p_v = p_h
    for step in range(k):
        p_v = _sigmoid(p_h @ W + v_bias)
        if step + 1 < k:
            p_h = _sigmoid(p_v @ W.T + h_bias)
    v_samp = jnp.where(p_v > rand.reshape(flat.shape), 1.0, 0.0).astype(v.dtype)
    return v_samp.reshape(v.shape), p_v.reshape(v.shape)


if __name__ == "__main__":
    # Small, lane-dense shapes consistent with the module (n_vis/n_hid on the
    # 128-lane axis).
    n_vis, n_hid, k = 256, 128, 3
    batch = 64

    key = jax.random.PRNGKey(0)
    k_w, k_vb, k_hb, k_v, k_r = jax.random.split(key, 5)
    W = 0.01 * jax.random.normal(k_w, (n_hid, n_vis), jnp.float32)
    v_bias = 0.01 * jax.random.normal(k_vb, (n_vis,), jnp.float32)
    h_bias = 0.01 * jax.random.normal(k_hb, (n_hid,), jnp.float32)
    # binary visible data, as an RBM would see
    v = (jax.random.uniform(k_v, (batch, n_vis)) > 0.5).astype(jnp.float32)
    rand = jax.random.uniform(k_r, (batch, n_vis), jnp.float32)

    v_in, v_samp, p_v = rbm_forward(v, W, v_bias, h_bias, rand, k=k, tile_b=512)
    v_samp = jax.block_until_ready(v_samp)

    v_samp_ref, p_v_ref = reference_forward(v, W, v_bias, h_bias, rand, k)

    assert v_in.shape == v.shape and v_samp.shape == v.shape
    assert jnp.allclose(p_v, p_v_ref, atol=1e-5, rtol=1e-5)
    # The Bernoulli sample may only differ where p_v sits within float noise of
    # its uniform threshold.
    boundary = jnp.abs(p_v_ref - rand) < 1e-4
    assert bool(jnp.all((v_samp == v_samp_ref) | boundary))
    print("KERNEL_OK")
</pallas_src>

<mosaic_0001>
module attributes {stable_mosaic.version = 11 : i64} {
  func.func @kernel(%arg0: i32, %arg1: memref<64x256xf32, #tpu.memory_space<vmem>>, %arg2: memref<64x256xf32, #tpu.memory_space<vmem>>, %arg3: memref<256x128xf32, #tpu.memory_space<vmem>>, %arg4: memref<128x256xf32, #tpu.memory_space<vmem>>, %arg5: memref<1x128xf32, #tpu.memory_space<vmem>>, %arg6: memref<1x256xf32, #tpu.memory_space<vmem>>, %arg7: memref<64x256xf32, #tpu.memory_space<vmem>>, %arg8: memref<64x256xf32, #tpu.memory_space<vmem>>) attributes {dimension_semantics = [#tpu.dimension_semantics<parallel>], iteration_bounds = array<i64: 1>, scalar_prefetch = 0 : i64, scratch_operands = 0 : i64, tpu.core_type = #tpu.core_type<tc>, window_params = [{transform_indices = @transform_0, window_bounds = array<i64: 64, 256>}, {transform_indices = @transform_1, window_bounds = array<i64: 64, 256>}, {pipeline_mode = #tpu.pipeline_mode<synchronous>, transform_indices = @transform_2, window_bounds = array<i64: 256, 128>}, {pipeline_mode = #tpu.pipeline_mode<synchronous>, transform_indices = @transform_3, window_bounds = array<i64: 128, 256>}, {pipeline_mode = #tpu.pipeline_mode<synchronous>, transform_indices = @transform_4, window_bounds = array<i64: 1, 128>}, {pipeline_mode = #tpu.pipeline_mode<synchronous>, transform_indices = @transform_5, window_bounds = array<i64: 1, 256>}, {transform_indices = @transform_6, window_bounds = array<i64: 64, 256>}, {transform_indices = @transform_7, window_bounds = array<i64: 64, 256>}]} {
    %c0 = arith.constant 0 : index
    %c0_0 = arith.constant 0 : index
    %0 = vector.load %arg1[%c0, %c0_0] : memref<64x256xf32, #tpu.memory_space<vmem>>, vector<64x256xf32>
    %c0_1 = arith.constant 0 : index
    %c0_2 = arith.constant 0 : index
    %1 = vector.load %arg3[%c0_1, %c0_2] : memref<256x128xf32, #tpu.memory_space<vmem>>, vector<256x128xf32>
    %c0_3 = arith.constant 0 : index
    %c0_4 = arith.constant 0 : index
    %2 = vector.load %arg4[%c0_3, %c0_4] : memref<128x256xf32, #tpu.memory_space<vmem>>, vector<128x256xf32>
    %c0_5 = arith.constant 0 : index
    %c0_6 = arith.constant 0 : index
    %3 = vector.load %arg5[%c0_5, %c0_6] : memref<1x128xf32, #tpu.memory_space<vmem>>, vector<1x128xf32>
    %c0_7 = arith.constant 0 : index
    %c0_8 = arith.constant 0 : index
    %4 = vector.load %arg6[%c0_7, %c0_8] : memref<1x256xf32, #tpu.memory_space<vmem>>, vector<1x256xf32>
    %cst = arith.constant dense<0.000000e+00> : vector<64x128xf32>
    %5 = tpu.matmul %0, %1, %cst {dimension_numbers = #tpu.dot_dimension_numbers<[1], [0], [0], [1], [0, 0, 1, 1], [], []>} : vector<64x256xf32>, vector<256x128xf32>, vector<64x128xf32> -> vector<64x128xf32>
    %6 = vector.broadcast %3 : vector<1x128xf32> to vector<64x128xf32>
    %7 = arith.addf %5, %6 : vector<64x128xf32>
    %cst_9 = arith.constant 5.000000e-01 : f32
    %8 = vector.broadcast %cst_9 : f32 to vector<64x128xf32>
    %9 = arith.mulf %8, %7 : vector<64x128xf32>
    %10 = math.tanh %9 : vector<64x128xf32>
    %cst_10 = arith.constant 1.000000e+00 : f32
    %11 = vector.broadcast %cst_10 : f32 to vector<64x128xf32>
    %12 = arith.addf %10, %11 : vector<64x128xf32>
    %cst_11 = arith.constant 5.000000e-01 : f32
    %13 = vector.broadcast %cst_11 : f32 to vector<64x128xf32>
    %14 = arith.mulf %13, %12 : vector<64x128xf32>
    %cst_12 = arith.constant dense<0.000000e+00> : vector<64x256xf32>
    %15 = tpu.matmul %14, %2, %cst_12 {dimension_numbers = #tpu.dot_dimension_numbers<[1], [0], [0], [1], [0, 0, 1, 1], [], []>} : vector<64x128xf32>, vector<128x256xf32>, vector<64x256xf32> -> vector<64x256xf32>
    %16 = vector.broadcast %4 : vector<1x256xf32> to vector<64x256xf32>
    %17 = arith.addf %15, %16 : vector<64x256xf32>
    %cst_13 = arith.constant 5.000000e-01 : f32
    %18 = vector.broadcast %cst_13 : f32 to vector<64x256xf32>
    %19 = arith.mulf %18, %17 : vector<64x256xf32>
    %20 = math.tanh %19 : vector<64x256xf32>
    %cst_14 = arith.constant 1.000000e+00 : f32
    %21 = vector.broadcast %cst_14 : f32 to vector<64x256xf32>
    %22 = arith.addf %20, %21 : vector<64x256xf32>
    %cst_15 = arith.constant 5.000000e-01 : f32
    %23 = vector.broadcast %cst_15 : f32 to vector<64x256xf32>
    %24 = arith.mulf %23, %22 : vector<64x256xf32>
    %cst_16 = arith.constant dense<0.000000e+00> : vector<64x128xf32>
    %25 = tpu.matmul %24, %1, %cst_16 {dimension_numbers = #tpu.dot_dimension_numbers<[1], [0], [0], [1], [0, 0, 1, 1], [], []>} : vector<64x256xf32>, vector<256x128xf32>, vector<64x128xf32> -> vector<64x128xf32>
    %26 = vector.broadcast %3 : vector<1x128xf32> to vector<64x128xf32>
    %27 = arith.addf %25, %26 : vector<64x128xf32>
    %cst_17 = arith.constant 5.000000e-01 : f32
    %28 = vector.broadcast %cst_17 : f32 to vector<64x128xf32>
    %29 = arith.mulf %28, %27 : vector<64x128xf32>
    %30 = math.tanh %29 : vector<64x128xf32>
    %cst_18 = arith.constant 1.000000e+00 : f32
    %31 = vector.broadcast %cst_18 : f32 to vector<64x128xf32>
    %32 = arith.addf %30, %31 : vector<64x128xf32>
    %cst_19 = arith.constant 5.000000e-01 : f32
    %33 = vector.broadcast %cst_19 : f32 to vector<64x128xf32>
    %34 = arith.mulf %33, %32 : vector<64x128xf32>
    %cst_20 = arith.constant dense<0.000000e+00> : vector<64x256xf32>
    %35 = tpu.matmul %34, %2, %cst_20 {dimension_numbers = #tpu.dot_dimension_numbers<[1], [0], [0], [1], [0, 0, 1, 1], [], []>} : vector<64x128xf32>, vector<128x256xf32>, vector<64x256xf32> -> vector<64x256xf32>
    %36 = vector.broadcast %4 : vector<1x256xf32> to vector<64x256xf32>
    %37 = arith.addf %35, %36 : vector<64x256xf32>
    %cst_21 = arith.constant 5.000000e-01 : f32
    %38 = vector.broadcast %cst_21 : f32 to vector<64x256xf32>
    %39 = arith.mulf %38, %37 : vector<64x256xf32>
    %40 = math.tanh %39 : vector<64x256xf32>
    %cst_22 = arith.constant 1.000000e+00 : f32
    %41 = vector.broadcast %cst_22 : f32 to vector<64x256xf32>
    %42 = arith.addf %40, %41 : vector<64x256xf32>
    %cst_23 = arith.constant 5.000000e-01 : f32
    %43 = vector.broadcast %cst_23 : f32 to vector<64x256xf32>
    %44 = arith.mulf %43, %42 : vector<64x256xf32>
    %cst_24 = arith.constant dense<0.000000e+00> : vector<64x128xf32>
    %45 = tpu.matmul %44, %1, %cst_24 {dimension_numbers = #tpu.dot_dimension_numbers<[1], [0], [0], [1], [0, 0, 1, 1], [], []>} : vector<64x256xf32>, vector<256x128xf32>, vector<64x128xf32> -> vector<64x128xf32>
    %46 = vector.broadcast %3 : vector<1x128xf32> to vector<64x128xf32>
    %47 = arith.addf %45, %46 : vector<64x128xf32>
    %cst_25 = arith.constant 5.000000e-01 : f32
    %48 = vector.broadcast %cst_25 : f32 to vector<64x128xf32>
    %49 = arith.mulf %48, %47 : vector<64x128xf32>
    %50 = math.tanh %49 : vector<64x128xf32>
    %cst_26 = arith.constant 1.000000e+00 : f32
    %51 = vector.broadcast %cst_26 : f32 to vector<64x128xf32>
    %52 = arith.addf %50, %51 : vector<64x128xf32>
    %cst_27 = arith.constant 5.000000e-01 : f32
    %53 = vector.broadcast %cst_27 : f32 to vector<64x128xf32>
    %54 = arith.mulf %53, %52 : vector<64x128xf32>
    %cst_28 = arith.constant dense<0.000000e+00> : vector<64x256xf32>
    %55 = tpu.matmul %54, %2, %cst_28 {dimension_numbers = #tpu.dot_dimension_numbers<[1], [0], [0], [1], [0, 0, 1, 1], [], []>} : vector<64x128xf32>, vector<128x256xf32>, vector<64x256xf32> -> vector<64x256xf32>
    %56 = vector.broadcast %4 : vector<1x256xf32> to vector<64x256xf32>
    %57 = arith.addf %55, %56 : vector<64x256xf32>
    %cst_29 = arith.constant 5.000000e-01 : f32
    %58 = vector.broadcast %cst_29 : f32 to vector<64x256xf32>
    %59 = arith.mulf %58, %57 : vector<64x256xf32>
    %60 = math.tanh %59 : vector<64x256xf32>
    %cst_30 = arith.constant 1.000000e+00 : f32
    %61 = vector.broadcast %cst_30 : f32 to vector<64x256xf32>
    %62 = arith.addf %60, %61 : vector<64x256xf32>
    %cst_31 = arith.constant 5.000000e-01 : f32
    %63 = vector.broadcast %cst_31 : f32 to vector<64x256xf32>
    %64 = arith.mulf %63, %62 : vector<64x256xf32>
    %c0_32 = arith.constant 0 : index
    %c0_33 = arith.constant 0 : index
    %65 = vector.load %arg2[%c0_32, %c0_33] : memref<64x256xf32, #tpu.memory_space<vmem>>, vector<64x256xf32>
    %66 = arith.cmpf ogt, %64, %65 : vector<64x256xf32>
    %cst_34 = arith.constant 1.000000e+00 : f32
    %cst_35 = arith.constant 0.000000e+00 : f32
    %67 = vector.broadcast %cst_34 : f32 to vector<64x256xf32>
    %68 = vector.broadcast %cst_35 : f32 to vector<64x256xf32>
    %69 = arith.select %66, %67, %68 : vector<64x256xi1>, vector<64x256xf32>
    %c0_36 = arith.constant 0 : index
    %c0_37 = arith.constant 0 : index
    %70 = vector.load %arg7[%c0_36, %c0_37] : memref<64x256xf32, #tpu.memory_space<vmem>>, vector<64x256xf32>
    tpu.vector_store %arg7[%c0_36, %c0_37], %64 {strides = array<i32>} : memref<64x256xf32, #tpu.memory_space<vmem>>, vector<64x256xf32>,
    %c0_38 = arith.constant 0 : index
    %c0_39 = arith.constant 0 : index
    %71 = vector.load %arg8[%c0_38, %c0_39] : memref<64x256xf32, #tpu.memory_space<vmem>>, vector<64x256xf32>
    tpu.vector_store %arg8[%c0_38, %c0_39], %69 {strides = array<i32>} : memref<64x256xf32, #tpu.memory_space<vmem>>, vector<64x256xf32>,
    return
  }
  func.func @transform_0(%arg0: i32) -> (i32, i32) {
    %c0_i32 = arith.constant 0 : i32
    %c0_i32_0 = arith.constant 0 : i32
    return %arg0, %c0_i32 : i32, i32
  }
  func.func @transform_1(%arg0: i32) -> (i32, i32) {
    %c0_i32 = arith.constant 0 : i32
    %c0_i32_0 = arith.constant 0 : i32
    return %arg0, %c0_i32 : i32, i32
  }
  func.func @transform_2(%arg0: i32) -> (i32, i32) {
    %c0_i32 = arith.constant 0 : i32
    %c0_i32_0 = arith.constant 0 : i32
    %c0_i32_1 = arith.constant 0 : i32
    return %c0_i32, %c0_i32_0 : i32, i32
  }
  func.func @transform_3(%arg0: i32) -> (i32, i32) {
    %c0_i32 = arith.constant 0 : i32
    %c0_i32_0 = arith.constant 0 : i32
    %c0_i32_1 = arith.constant 0 : i32
    return %c0_i32, %c0_i32_0 : i32, i32
  }
  func.func @transform_4(%arg0: i32) -> (i32, i32) {
    %c0_i32 = arith.constant 0 : i32
    %c0_i32_0 = arith.constant 0 : i32
    %c0_i32_1 = arith.constant 0 : i32
    return %c0_i32, %c0_i32_0 : i32, i32
  }
  func.func @transform_5(%arg0: i32) -> (i32, i32) {
    %c0_i32 = arith.constant 0 : i32
    %c0_i32_0 = arith.constant 0 : i32
    %c0_i32_1 = arith.constant 0 : i32
    return %c0_i32, %c0_i32_0 : i32, i32
  }
  func.func @transform_6(%arg0: i32) -> (i32, i32) {
    %c0_i32 = arith.constant 0 : i32
    %c0_i32_0 = arith.constant 0 : i32
    return %arg0, %c0_i32 : i32, i32
  }
  func.func @transform_7(%arg0: i32) -> (i32, i32) {
    %c0_i32 = arith.constant 0 : i32
    %c0_i32_0 = arith.constant 0 : i32
    return %arg0, %c0_i32 : i32, i32
  }
}

</mosaic_0001>

<bundles_post_ra>
// kernel: tpu_custom_call.1
= control target key start
LH: loop header
LB: loop body
LE: loop exit
PB: predicated region body
PF: predicated region fallthrough
CT: control target
= control target key end

     0   :  { %13 = vsyncpa [#allocation3], 0  ;;  %s2332_s0 = inlined_call_operand.hbm [shape: f32[64,256], index: 0, kind: input, shape index: {}]   ;;  %s2333_s1 = inlined_call_operand.hbm [shape: f32[64,256], index: 1, kind: input, shape index: {}]   ;;  %s2334_s2 = inlined_call_operand.hbm [shape: f32[256,128], index: 2, kind: input, shape index: {}]   ;;  %s2335_s3 = inlined_call_operand.hbm [shape: f32[128,256], index: 3, kind: input, shape index: {}]   ;;  %s2336_s4 = inlined_call_operand.vmem [shape: f32[1,128], index: 4, kind: input, shape index: {}]   ;;  %s2337_s5 = inlined_call_operand.vmem [shape: f32[1,256], index: 5, kind: input, shape index: {}]   ;;  %s2338_s6 = inlined_call_operand.hbm [shape: f32[64,256], index: 6, kind: output, shape index: {0}]   ;;  %s2339_s7 = inlined_call_operand.hbm [shape: f32[64,256], index: 7, kind: output, shape index: {1}]  }
   0x1   :  { %14 = vsyncpa [#allocation6], 0 }
   0x2   :  { %15 = vsyncpa [#allocation9], 0 }
   0x3   :  { %16 = vsyncpa [#allocation4], 0 }
   0x4   :  { %17 = vsyncpa [#allocation12], 0  ;;  %s1897_s24 = smov [#allocation5]   ;;  %s1898_s26 = smov [#allocation2]  }
   0x5   :  { %s35_s25 = sshll.u32 %s1897_s24, 4  ;;  %s23_s27 = sshll.u32 %s1898_s26, 4  ;;  %s36_s25 = int_to_ptr.vmem [resolvable:$true] %s35_s25  ;;  %s1948_s27 = int_to_ptr.vmem [resolvable:$true] %s23_s27 }
   0x6   :  { %s1755_s30 = scalar_lea.hbm %s2333_s1, 2048 }
   0x7   :  { %p1756_p0 = scmp.ne.s32.totalorder %s2333_s1, %s1755_s30  ;;  %p1759_p1 = scmp.lt.u32.totalorder %s1755_s30, %s2333_s1 }
   0x9   :  { %p1761_p2 = pnand %p1759_p1, %p1756_p0 }
   0xb   :  { %1764 = shalt.err (!%p1761_p2)
}
   0xc   :  { %s1765_s12 = scalar_lea.vmem %s36_s25, 2048  ;;  %p1770_p4 = scmp.lt.s32.totalorder %s36_s25, %s36_s25 }
   0xd   :  { %p1766_p3 = scmp.ne.s32.totalorder %s36_s25, %s1765_s12  ;;  %p1771_p5 = scmp.lt.s32.totalorder %s1765_s12, %s1765_s12 }
   0xf   :  { %p1772_p6 = por %p1771_p5, %p1770_p4 }
  0x11   :  { %p1773_p7 = pnand %p1772_p6, %p1766_p3 }
  0x13   :  { %1776 = shalt.err (!%p1773_p7)
}
  0x14   :  { %s1899_s13 = smov 256   ;;  %s1900_s14 = smov 16  }
  0x15   :  { %41 = dma.hbm_to_vmem [thread:$0]  %s2333_s1, 2048, %s36_s25, [#allocation6], %s1899_s13, %s1899_s13, %s1900_s14  }
  0x16   :  { %s1777_s19 = scalar_lea.hbm %s2332_s0, 2048 }
  0x17   :  { %p1778_p8 = scmp.ne.s32.totalorder %s2332_s0, %s1777_s19  ;;  %p1781_p9 = scmp.lt.u32.totalorder %s1777_s19, %s2332_s0 }
  0x19   :  { %p1783_p10 = pnand %p1781_p9, %p1778_p8 }
  0x1b   :  { %1786 = shalt.err (!%p1783_p10)
}
  0x1c   :  { %s1787_s24 = scalar_lea.vmem %s1948_s27, 2048  ;;  %p1792_p12 = scmp.lt.s32.totalorder %s1948_s27, %s1948_s27 }
  0x1d   :  { %p1788_p11 = scmp.ne.s32.totalorder %s1948_s27, %s1787_s24  ;;  %p1793_p13 = scmp.lt.s32.totalorder %s1787_s24, %s1787_s24 }
  0x1f   :  { %p1794_p0 = por %p1793_p13, %p1792_p12 }
  0x21   :  { %p1795_p1 = pnand %p1794_p0, %p1788_p11 }
  0x23   :  { %1798 = shalt.err (!%p1795_p1)
}
  0x24   :  { %29 = dma.hbm_to_vmem [thread:$0]  %s2332_s0, 2048, %s1948_s27, [#allocation3], %s1899_s13, %s1899_s13, %s1900_s14  }
  0x25   :  { %s1901_s26 = smov [#allocation7]   ;;  %s1799_s8 = scalar_lea.hbm %s2334_s2, 4096 }
  0x26   :  { %s47_s28 = sshll.u32 %s1901_s26, 4  ;;  %p1800_p2 = scmp.ne.s32.totalorder %s2334_s2, %s1799_s8  ;;  %s48_s28 = int_to_ptr.vmem [resolvable:$true] %s47_s28 }
  0x27   :  { %p1803_p3 = scmp.lt.u32.totalorder %s1799_s8, %s2334_s2 }
  0x29   :  { %p1805_p4 = pnand %p1803_p3, %p1800_p2 }
  0x2b   :  { %1808 = shalt.err (!%p1805_p4)
}
  0x2c   :  { %s1809_s15 = scalar_lea.vmem %s48_s28, 4096  ;;  %p1814_p6 = scmp.lt.s32.totalorder %s48_s28, %s48_s28 }
  0x2d   :  { %p1810_p5 = scmp.ne.s32.totalorder %s48_s28, %s1809_s15  ;;  %p1815_p7 = scmp.lt.s32.totalorder %s1809_s15, %s1809_s15 }
  0x2f   :  { %p1816_p8 = por %p1815_p7, %p1814_p6 }
  0x31   :  { %p1817_p9 = pnand %p1816_p8, %p1810_p5 }
  0x33   :  { %1820 = shalt.err (!%p1817_p9)
}
  0x34   :  { %s1902_s0 = smov 128   ;;  %s1903_s27 = smov 8  }
  0x35   :  { %53 = dma.hbm_to_vmem [thread:$0]  %s2334_s2, 4096, %s48_s28, [#allocation6], %s1902_s0, %s1902_s0, %s1903_s27  }
  0x36   :  { %s1904_s18 = smov [#allocation8]   ;;  %s1821_s22 = scalar_lea.hbm %s2335_s3, 4096 }
  0x37   :  { %s59_s19 = sshll.u32 %s1904_s18, 4  ;;  %p1822_p10 = scmp.ne.s32.totalorder %s2335_s3, %s1821_s22  ;;  %s60_s19 = int_to_ptr.vmem [resolvable:$true] %s59_s19 }
  0x38   :  { %p1825_p11 = scmp.lt.u32.totalorder %s1821_s22, %s2335_s3 }
  0x3a   :  { %p1827_p12 = pnand %p1825_p11, %p1822_p10 }
  0x3c   :  { %1830 = shalt.err (!%p1827_p12)
}
  0x3d   :  { %s1831_s26 = scalar_lea.vmem %s60_s19, 4096  ;;  %p1836_p0 = scmp.lt.s32.totalorder %s60_s19, %s60_s19 }
  0x3e   :  { %p1832_p13 = scmp.ne.s32.totalorder %s60_s19, %s1831_s26  ;;  %p1837_p1 = scmp.lt.s32.totalorder %s1831_s26, %s1831_s26 }
  0x40   :  { %p1838_p2 = por %p1837_p1, %p1836_p0 }
  0x42   :  { %p1839_p3 = pnand %p1838_p2, %p1832_p13 }
  0x44   :  { %1842 = shalt.err (!%p1839_p3)
}
  0x45   :  { %65 = dma.hbm_to_vmem [thread:$0]  %s2335_s3, 4096, %s60_s19, [#allocation9], %s1899_s13, %s1899_s13, %s1900_s14  }
  0x46   :  { %1887 = dma.done.wait [#allocation3], 2048  }
  0x47   :  { %1888 = vsyncadd [#allocation3], 4294965248 }
  0x48   :  { %1889 = dma.done.wait [#allocation6], 6144  }
  0x49   :  { %1890 = vsyncadd [#allocation6], 4294961152 }
  0x4a   :  { %1891 = dma.done.wait [#allocation9], 4096  }
  0x4b   :  { %1892 = vsyncadd [#allocation9], 4294963200  ;;  %v114_v0 = vld [vmem:[#allocation7 + $0x80] sm:$0xff]  ;;  %v115_v1 = vld [vmem:[#allocation7 + $0x88] sm:$0xff]  ;;  %s1907_s11 = smov [#allocation11]  }
  0x4c   :  { %v98_v2 = vld [vmem:[#allocation7] sm:$0xff]  ;;  %v2012_v3 = vpack.c.bf16 %v115_v1, %v114_v0  ;;  %v99_v4 = vld [vmem:[#allocation7 + $0x8] sm:$0xff]  ;;  %v116_v5 = vld [vmem:[#allocation7 + $0x90] sm:$0xff]  ;;  %s1220_s12 = sshll.u32 %s1907_s11, 4  ;;  %s2294_s12 = int_to_ptr.vmem [resolvable:$true] %s1220_s12 }
  0x4d   :  { %v117_v6 = vld [vmem:[#allocation7 + $0x98] sm:$0xff]  ;;  %v2014_v7 = vpack.c.bf16 %v99_v4, %v98_v2  ;;  %v100_v9 = vld [vmem:[#allocation7 + $0x10] sm:$0xff]  ;;  %v118_v11 = vld [vmem:[#allocation7 + $0xa0] sm:$0xff] }
  0x4e   :  { %v2016_v8 = vpack.c.bf16 %v117_v6, %v116_v5  ;;  %v101_v10 = vld [vmem:[#allocation7 + $0x18] sm:$0xff]  ;;  %1408 = vmatprep.subr.bf16.mxu0 %v2012_v3  ;;  %v119_v12 = vld [vmem:[#allocation7 + $0xa8] sm:$0xff]  ;;  %v102_v15 = vld [vmem:[#allocation7 + $0x20] sm:$0xff] }
  0x4f   :  { %1410 = vmatpush3.bf16.msra.mxu0 %v2014_v7  ;;  %v2020_v13 = vpack.c.bf16 %v101_v10, %v100_v9  ;;  %v2023_v14 = vpack.c.bf16 %v119_v12, %v118_v11  ;;  %v103_v16 = vld [vmem:[#allocation7 + $0x28] sm:$0xff]  ;;  %v120_v17 = vld [vmem:[#allocation7 + $0xb0] sm:$0xff]  ;;  %v121_v18 = vld [vmem:[#allocation7 + $0xb8] sm:$0xff] }
  0x50   :  { %1412 = vmatprep.subr.bf16.mxu0 %v2016_v8  ;;  %v2026_v19 = vpack.c.bf16 %v103_v16, %v102_v15  ;;  %v2029_v20 = vpack.c.bf16 %v121_v18, %v120_v17  ;;  %v104_v21 = vld [vmem:[#allocation7 + $0x30] sm:$0xff]  ;;  %v105_v22 = vld [vmem:[#allocation7 + $0x38] sm:$0xff]  ;;  %v122_v23 = vld [vmem:[#allocation7 + $0xc0] sm:$0xff] }
  0x51   :  { %v123_v24 = vld [vmem:[#allocation7 + $0xc8] sm:$0xff]  ;;  %v2032_v26 = vpack.c.bf16 %v105_v22, %v104_v21  ;;  %v106_v28 = vld [vmem:[#allocation7 + $0x40] sm:$0xff]  ;;  %v124_v30 = vld [vmem:[#allocation7 + $0xd0] sm:$0xff] }
  0x52   :  { %v83_v25 = vld [vmem:[#allocation2 + $0x8] sm:$0xff]  ;;  %v2035_v27 = vpack.c.bf16 %v123_v24, %v122_v23  ;;  %v125_v31 = vld [vmem:[#allocation7 + $0xd8] sm:$0xff]  ;;  %v108_v32 = vld [vmem:[#allocation7 + $0x50] sm:$0xff] }
  0x53   :  { %1414 = vmatpush3.bf16.msra.mxu0 %v2020_v13  ;;  %234 = vmatprep.mubr.f32.mxu0 %v83_v25  ;;  %v107_v29 = vld [vmem:[#allocation7 + $0x48] sm:$0xff]  ;;  %v109_v33 = vld [vmem:[#allocation7 + $0x58] sm:$0xff]  ;;  %v126_v35 = vld [vmem:[#allocation7 + $0xe0] sm:$0xff]  ;;  %v2041_v40 = vpack.c.bf16 %v125_v31, %v124_v30 }
  0x54   :  { %1416 = vmatprep.subr.bf16.mxu0 %v2023_v14  ;;  %v2038_v34 = vpack.c.bf16 %v107_v29, %v106_v28  ;;  %v127_v36 = vld [vmem:[#allocation7 + $0xe8] sm:$0xff]  ;;  %v133_v38 = vld [vmem:[#allocation8 + $0x18] sm:$0xff]  ;;  %v130_v39 = vld [vmem:[#allocation8] sm:$0xff]  ;;  %v2051_v51 = vpack.c.bf16 %v109_v33, %v108_v32 }
  0x55   :  { %v131_v37 = vld [vmem:[#allocation8 + $0x8] sm:$0xff]  ;;  %v132_v42 = vld [vmem:[#allocation8 + $0x10] sm:$0xff]  ;;  %v137_v44 = vld [vmem:[#allocation8 + $0x38] sm:$0xff]  ;;  %v2057_v53 = vpack.c.bf16 %v127_v36, %v126_v35 }
  0x56   :  { %v2043_v41 = vpack.c.bf16 %v133_v38, %v131_v37  ;;  %v135_v43 = vld [vmem:[#allocation8 + $0x28] sm:$0xff]  ;;  %v2045_v45 = vpack.c.bf16 %v132_v42, %v130_v39  ;;  %v134_v47 = vld [vmem:[#allocation8 + $0x20] sm:$0xff]  ;;  %v136_v48 = vld [vmem:[#allocation8 + $0x30] sm:$0xff] }
  0x57   :  { %1418 = vmatpush3.bf16.msra.mxu0 %v2026_v19  ;;  %v2047_v46 = vpack.c.bf16 %v137_v44, %v135_v43  ;;  %v139_v49 = vld [vmem:[#allocation8 + $0x48] sm:$0xff]  ;;  %v141_v50 = vld [vmem:[#allocation8 + $0x58] sm:$0xff]  ;;  %v2054_v52 = vpack.c.bf16 %v136_v48, %v134_v47  ;;  %v110_v54 = vld [vmem:[#allocation7 + $0x60] sm:$0xff] }
  0x58   :  { %1420 = vmatprep.subr.bf16.mxu0 %v2029_v20  ;;  %1440 = vmatprep.subr.bf16.mxu1 %v2043_v41  ;;  %v111_v55 = vld [vmem:[#allocation7 + $0x68] sm:$0xff]  ;;  %v2060_v56 = vpack.c.bf16 %v141_v50, %v139_v49  ;;  %v128_v57 = vld [vmem:[#allocation7 + $0xf0] sm:$0xff]  ;;  %v129_v58 = vld [vmem:[#allocation7 + $0xf8] sm:$0xff] }
  0x59   :  { %1442 = vmatpush1.bf16.msra.mxu1 %v2045_v45  ;;  %v2063_v59 = vpack.c.bf16 %v111_v55, %v110_v54  ;;  %v2067_v60 = vpack.c.bf16 %v129_v58, %v128_v57  ;;  %v112_v61 = vld [vmem:[#allocation7 + $0x70] sm:$0xff]  ;;  %v113_v62 = vld [vmem:[#allocation7 + $0x78] sm:$0xff]  ;;  %v82_v0 = vld [vmem:[#allocation2] sm:$0xff] }
  0x5a   :  { %1444 = vmatprep.subr.bf16.mxu1 %v2047_v46  ;;  %v2071_v63 = vpack.c.bf16 %v113_v62, %v112_v61  ;;  %v85_v1 = vld [vmem:[#allocation2 + $0x18] sm:$0xff]  ;;  %v84_v2 = vld [vmem:[#allocation2 + $0x10] sm:$0xff]  ;;  %v87_v4 = vld [vmem:[#allocation2 + $0x28] sm:$0xff] }
  0x5b   :  { %1422 = vmatpush3.bf16.msra.mxu0 %v2032_v26  ;;  %v86_v5 = vld [vmem:[#allocation2 + $0x20] sm:$0xff]  ;;  %v89_v6 = vld [vmem:[#allocation2 + $0x38] sm:$0xff]  ;;  %v88_v9 = vld [vmem:[#allocation2 + $0x30] sm:$0xff] }
  0x5c   :  { %1424 = vmatprep.subr.bf16.mxu0 %v2035_v27  ;;  %v91_v10 = vld [vmem:[#allocation2 + $0x48] sm:$0xff]  ;;  %v90_v11 = vld [vmem:[#allocation2 + $0x40] sm:$0xff]  ;;  %v93_v12 = vld [vmem:[#allocation2 + $0x58] sm:$0xff] }
  0x5d   :  { %1446 = vmatpush1.bf16.msra.mxu1 %v2054_v52  ;;  %v92_v15 = vld [vmem:[#allocation2 + $0x50] sm:$0xff]  ;;  %v95_v16 = vld [vmem:[#allocation2 + $0x68] sm:$0xff]  ;;  %v94_v17 = vld [vmem:[#allocation2 + $0x60] sm:$0xff] }
  0x5e   :  { %1448 = vmatprep.subr.bf16.mxu1 %v2060_v56  ;;  %v97_v18 = vld [vmem:[#allocation2 + $0x78] sm:$0xff]  ;;  %v96_v21 = vld [vmem:[#allocation2 + $0x70] sm:$0xff]  ;;  %v138_v22 = vld [vmem:[#allocation8 + $0x40] sm:$0xff] }
  0x5f   :  { %1426 = vmatpush3.bf16.msra.mxu0 %v2038_v34  ;;  %v140_v23 = vld [vmem:[#allocation8 + $0x50] sm:$0xff]  ;;  %v143_v25 = vld [vmem:[#allocation8 + $0x68] sm:$0xff]  ;;  %v145_v28 = vld [vmem:[#allocation8 + $0x78] sm:$0xff] }
  0x60   :  { %1428 = vmatprep.subr.bf16.mxu0 %v2041_v40  ;;  %v2092_v24 = vpack.c.bf16 %v140_v23, %v138_v22  ;;  %v2095_v29 = vpack.c.bf16 %v145_v28, %v143_v25  ;;  %v142_v30 = vld [vmem:[#allocation8 + $0x60] sm:$0xff]  ;;  %v144_v31 = vld [vmem:[#allocation8 + $0x70] sm:$0xff]  ;;  %v147_v33 = vld [vmem:[#allocation8 + $0x88] sm:$0xff] }
  0x61   :  { %v2097_v32 = vpack.c.bf16 %v144_v31, %v142_v30  ;;  %v146_v36 = vld [vmem:[#allocation8 + $0x80] sm:$0xff]  ;;  %v148_v37 = vld [vmem:[#allocation8 + $0x90] sm:$0xff]  ;;  %v151_v39 = vld [vmem:[#allocation8 + $0xa8] sm:$0xff] }
  0x62   :  { %1450 = vmatpush1.bf16.msra.mxu1 %v2092_v24  ;;  %v2103_v38 = vpack.c.bf16 %v148_v37, %v146_v36  ;;  %v153_v42 = vld [vmem:[#allocation8 + $0xb8] sm:$0xff]  ;;  %v150_v44 = vld [vmem:[#allocation8 + $0xa0] sm:$0xff]  ;;  %v152_v47 = vld [vmem:[#allocation8 + $0xb0] sm:$0xff] }
  0x63   :  { %1430 = vmatpush3.bf16.msra.mxu0 %v2051_v51  ;;  %1452 = vmatprep.subr.bf16.mxu1 %v2095_v29  ;;  %v2107_v43 = vpack.c.bf16 %v153_v42, %v151_v39  ;;  %v2109_v48 = vpack.c.bf16 %v152_v47, %v150_v44  ;;  %v155_v49 = vld [vmem:[#allocation8 + $0xc8] sm:$0xff]  ;;  %v157_v50 = vld [vmem:[#allocation8 + $0xd8] sm:$0xff]  ;;  %v154_v55 = vld [vmem:[#allocation8 + $0xc0] sm:$0xff] }
  0x64   :  { %1432 = vmatprep.subr.bf16.mxu0 %v2057_v53  ;;  %v2113_v54 = vpack.c.bf16 %v157_v50, %v155_v49  ;;  %v156_v57 = vld [vmem:[#allocation8 + $0xd0] sm:$0xff]  ;;  %v159_v61 = vld [vmem:[#allocation8 + $0xe8] sm:$0xff]  ;;  %v161_v62 = vld [vmem:[#allocation8 + $0xf8] sm:$0xff] }
  0x65   :  { %v2115_v58 = vpack.c.bf16 %v156_v57, %v154_v55 }
  0x66   :  { %1454 = vmatpush1.bf16.msra.mxu1 %v2097_v32 }
  0x67   :  { %1434 = vmatpush3.bf16.msra.mxu0 %v2063_v59 }
  0x68   :  { %1436 = vmatprep.subr.bf16.mxu0 %v2067_v60 }
  0x6b   :  { %1438 = vmatpush3.bf16.msra.mxu0 %v2071_v63 }
  0x6c   :  { %1472 = vmatprep.subr.bf16.mxu0 %v2012_v3 }
  0x6e   :  { %235 = vmatmul.mubr.f32.vlgmr.msra.gmra.mrb[0].mxu0 %v82_v0  ;;  %v2119_v0 = vpack.c.bf16 %v161_v62, %v159_v61 }
  0x6f   :  { %239 = vmatprep.mubr.f32.mxu0 %v85_v1  ;;  %1474 = vmatpush3.bf16.msra.mxu0 %v2014_v7  ;;  %v158_v1 = vld [vmem:[#allocation8 + $0xe0] sm:$0xff] }
  0x70   :  { %1476 = vmatprep.subr.bf16.mxu0 %v2016_v8 }
  0x72   :  { %240 = vmatmul.mubr.f32.gmra.mrb[2].mxu0 %v84_v2  ;;  %v160_v2 = vld [vmem:[#allocation8 + $0xf0] sm:$0xff] }
  0x73   :  { %244 = vmatprep.mubr.f32.mxu0 %v87_v4  ;;  %1478 = vmatpush3.bf16.msra.mxu0 %v2020_v13  ;;  %v2121_v4 = vpack.c.bf16 %v160_v2, %v158_v1 }
  0x74   :  { %1480 = vmatprep.subr.bf16.mxu0 %v2023_v14 }
  0x76   :  { %245 = vmatmul.mubr.f32.gmra.mrb[4].mxu0 %v86_v5  ;;  %v1905_v5 = vmov 0.0  }
  0x77   :  { %249 = vmatprep.mubr.f32.mxu0 %v89_v6  ;;  %1482 = vmatpush3.bf16.msra.mxu0 %v2026_v19 }
  0x78   :  { %1484 = vmatprep.subr.bf16.mxu0 %v2029_v20  ;;  %382 = vmatprep.mubr.f32.mxu1 %v1905_v5 }
  0x7a   :  { %250 = vmatmul.mubr.f32.gmra.mrb[6].mxu0 %v88_v9  ;;  %v2130_v9 = vld [vmem:[%s2336_s4] ss:$0 sm:$0xff] }
  0x7b   :  { %254 = vmatprep.mubr.f32.mxu0 %v91_v10  ;;  %1486 = vmatpush3.bf16.msra.mxu0 %v2032_v26 }
  0x7c   :  { %1488 = vmatprep.subr.bf16.mxu0 %v2035_v27 }
  0x7e   :  { %255 = vmatmul.mubr.f32.gmra.mrb[8].mxu0 %v90_v11 }
  0x7f   :  { %259 = vmatprep.mubr.f32.mxu0 %v93_v12  ;;  %1490 = vmatpush3.bf16.msra.mxu0 %v2038_v34 }
  0x80   :  { %1492 = vmatprep.subr.bf16.mxu0 %v2041_v40 }
  0x82   :  { %260 = vmatmul.mubr.f32.gmra.mrb[10].mxu0 %v92_v15 }
  0x83   :  { %264 = vmatprep.mubr.f32.mxu0 %v95_v16  ;;  %1494 = vmatpush3.bf16.msra.mxu0 %v2051_v51 }
  0x84   :  { %1496 = vmatprep.subr.bf16.mxu0 %v2057_v53 }
  0x86   :  { %265 = vmatmul.mubr.f32.gmra.mrb[12].mxu0 %v94_v17 }
  0x87   :  { %269 = vmatprep.mubr.f32.mxu0 %v97_v18  ;;  %1498 = vmatpush3.bf16.msra.mxu0 %v2063_v59 }
  0x88   :  { %1500 = vmatprep.subr.bf16.mxu0 %v2067_v60 }
  0x8a   :  { %270 = vmatmul.mubr.f32.gmra.mrb[14].mxu0 %v96_v21 }
  0x8b   :  { %1502 = vmatpush3.bf16.msra.mxu0 %v2071_v63 }
  0x8c   :  { %1536 = vmatprep.subr.bf16.mxu0 %v2012_v3  ;;  %v149_v3 = vld [vmem:[#allocation8 + $0x98] sm:$0xff] }
  0x8d   :  { %v2101_v35 = vpack.c.bf16 %v149_v3, %v147_v33 }
  0x8f   :  { %1456 = vmatprep.subr.bf16.mxu1 %v2101_v35 }
  0x90   :  { %1458 = vmatpush1.bf16.msra.mxu1 %v2103_v38 }
  0x91   :  { %1460 = vmatprep.subr.bf16.mxu1 %v2107_v43 }
  0x94   :  { %1462 = vmatpush1.bf16.msra.mxu1 %v2109_v48 }
  0x95   :  { %1464 = vmatprep.subr.bf16.mxu1 %v2113_v54 }
  0x98   :  { %1466 = vmatpush1.bf16.msra.mxu1 %v2115_v58 }
  0x99   :  { %1468 = vmatprep.subr.bf16.mxu1 %v2119_v0 }
  0x9c   :  { %1470 = vmatpush1.bf16.msra.mxu1 %v2121_v4 }
  0x9d   :  { %1504 = vmatprep.subr.bf16.mxu1 %v2043_v41 }
 0x141   :  { %v1271_v6 = vpop.f32.mrb[0].mxu0 }
 0x142   :  { %v1272_v10 = vpop.f32.mrb[1].mxu0 }
 0x143   :  { %v1273_v11 = vadd.f32 %v1272_v10, %v1271_v6 }
 0x145   :  { %v237_v12 = vadd.f32 %v1273_v11, %v2130_v9  ;;  %v1274_v15 = vpop.f32.mrb[2].mxu0 }
 0x146   :  { %v1275_v16 = vpop.f32.mrb[3].mxu0 }
 0x147   :  { %v275_v17 = vmul.f32 0.5, %v237_v12  ;;  %v1276_v18 = vadd.f32 %v1275_v16, %v1274_v15 }
 0x149   :  { %1610 = vtanh.f32 %v275_v17  ;;  %v242_v21 = vadd.f32 %v1276_v18, %v2130_v9  ;;  %v1277_v22 = vpop.f32.mrb[4].mxu0 }
 0x14a   :  { %v1278_v23 = vpop.f32.mrb[5].mxu0 }
 0x14b   :  { %v276_v25 = vmul.f32 0.5, %v242_v21  ;;  %v1279_v28 = vadd.f32 %v1278_v23, %v1277_v22 }
 0x14d   :  { %1612 = vtanh.f32 %v276_v25  ;;  %v247_v30 = vadd.f32 %v1279_v28, %v2130_v9  ;;  %v1280_v31 = vpop.f32.mrb[6].mxu0 }
 0x14e   :  { %v1281_v33 = vpop.f32.mrb[7].mxu0 }
 0x14f   :  { %v277_v3 = vmul.f32 0.5, %v247_v30  ;;  %v1282_v36 = vadd.f32 %v1281_v33, %v1280_v31 }
 0x151   :  { %1614 = vtanh.f32 %v277_v3  ;;  %v252_v37 = vadd.f32 %v1282_v36, %v2130_v9  ;;  %v1283_v39 = vpop.f32.mrb[8].mxu0 }
 0x152   :  { %v1284_v42 = vpop.f32.mrb[9].mxu0 }
 0x153   :  { %v1611_v44 = vpop.eup %1610  ;;  %v278_v47 = vmul.f32 0.5, %v252_v37  ;;  %v1285_v49 = vadd.f32 %v1284_v42, %v1283_v39 }
 0x154   :  { %v291_v50 = vadd.f32 1.0, %v1611_v44 }
 0x155   :  { %1616 = vtanh.f32 %v278_v47  ;;  %v257_v55 = vadd.f32 %v1285_v49, %v2130_v9  ;;  %v1286_v57 = vpop.f32.mrb[10].mxu0 }
 0x156   :  { %v1287_v61 = vpop.f32.mrb[11].mxu0  ;;  %v299_v62 = vmul.f32 0.5, %v291_v50 }
 0x157   :  { %v1613_v1 = vpop.eup %1612  ;;  %v279_v2 = vmul.f32 0.5, %v257_v55  ;;  %v1288_v6 = vadd.f32 %v1287_v61, %v1286_v57 }
 0x158   :  { %383 = vmatmul.mubr.f32.vlgmr.msra.gmra.mrb[0].mxu1 %v299_v62  ;;  %v292_v10 = vadd.f32 1.0, %v1613_v1 }
 0x159   :  { %1618 = vtanh.f32 %v279_v2  ;;  %v262_v11 = vadd.f32 %v1288_v6, %v2130_v9  ;;  %v1289_v12 = vpop.f32.mrb[12].mxu0  ;;  %388 = vmatprep.mubr.f32.mxu1 %v1905_v5  ;;  %1506 = vmatpush1.bf16.msra.mxu1 %v2045_v45 }
 0x15a   :  { %v1290_v15 = vpop.f32.mrb[13].mxu0  ;;  %v300_v16 = vmul.f32 0.5, %v292_v10  ;;  %1508 = vmatprep.subr.bf16.mxu1 %v2047_v46 }
 0x15b   :  { %v1615_v17 = vpop.eup %1614  ;;  %v280_v18 = vmul.f32 0.5, %v262_v11  ;;  %v1291_v21 = vadd.f32 %v1290_v15, %v1289_v12  ;;  %v308_v11 = vlaneseq }
 0x15c   :  { %389 = vmatmul.mubr.f32.gmra.mrb[2].mxu1 %v300_v16  ;;  %v293_v22 = vadd.f32 1.0, %v1615_v17  ;;  %v163_v16 = vld [vmem:[%s2337_s5] sm:$0x3] }
 0x15d   :  { %1620 = vtanh.f32 %v280_v18  ;;  %v267_v23 = vadd.f32 %v1291_v21, %v2130_v9  ;;  %v1292_v25 = vpop.f32.mrb[14].mxu0  ;;  %394 = vmatprep.mubr.f32.mxu1 %v1905_v5  ;;  %1510 = vmatpush1.bf16.msra.mxu1 %v2054_v52  ;;  %v309_v12 = vshrl.u32 %v308_v11, 7 }
 0x15e   :  { %v1293_v28 = vpop.f32.mrb[15].mxu0  ;;  %v301_v30 = vmul.f32 0.5, %v293_v22  ;;  %1512 = vmatprep.subr.bf16.mxu1 %v2060_v56 }
 0x15f   :  { %v1617_v31 = vpop.eup %1616  ;;  %v281_v33 = vmul.f32 0.5, %v267_v23  ;;  %v1294_v3 = vadd.f32 %v1293_v28, %v1292_v25  ;;  %v310_v15 = vsub.s32 0, %v309_v12  ;;  %v314_v17 = vsub.s32 1, %v309_v12 }
 0x160   :  { %395 = vmatmul.mubr.f32.gmra.mrb[4].mxu1 %v301_v30  ;;  %v294_v36 = vadd.f32 1.0, %v1617_v31 }
 0x161   :  { %1622 = vtanh.f32 %v281_v33  ;;  %v272_v37 = vadd.f32 %v1294_v3, %v2130_v9  ;;  %400 = vmatprep.mubr.f32.mxu1 %v1905_v5  ;;  %1514 = vmatpush1.bf16.msra.mxu1 %v2092_v24  ;;  %v2167_v18 = vrot.slane %v163_v16, %v310_v15  ;;  %v2169_v21 = vrot.slane %v163_v16, %v314_v17 }
 0x162   :  { %v302_v39 = vmul.f32 0.5, %v294_v36  ;;  %1516 = vmatprep.subr.bf16.mxu1 %v2095_v29 }
 0x163   :  { %v1619_v42 = vpop.eup %1618  ;;  %v282_v44 = vmul.f32 0.5, %v272_v37 }
 0x164   :  { %401 = vmatmul.mubr.f32.gmra.mrb[6].mxu1 %v302_v39  ;;  %v295_v47 = vadd.f32 1.0, %v1619_v42 }
 0x165   :  { %1624 = vtanh.f32 %v282_v44  ;;  %406 = vmatprep.mubr.f32.mxu1 %v1905_v5  ;;  %1518 = vmatpush1.bf16.msra.mxu1 %v2097_v32 }
 0x166   :  { %v303_v49 = vmul.f32 0.5, %v295_v47  ;;  %1520 = vmatprep.subr.bf16.mxu1 %v2101_v35 }
 0x167   :  { %v1621_v50 = vpop.eup %1620 }
 0x168   :  { %407 = vmatmul.mubr.f32.gmra.mrb[8].mxu1 %v303_v49  ;;  %v296_v55 = vadd.f32 1.0, %v1621_v50 }
 0x169   :  { %412 = vmatprep.mubr.f32.mxu1 %v1905_v5  ;;  %1522 = vmatpush1.bf16.msra.mxu1 %v2103_v38 }
 0x16a   :  { %v304_v57 = vmul.f32 0.5, %v296_v55  ;;  %1524 = vmatprep.subr.bf16.mxu1 %v2107_v43 }
 0x16b   :  { %v1623_v61 = vpop.eup %1622 }
 0x16c   :  { %413 = vmatmul.mubr.f32.gmra.mrb[10].mxu1 %v304_v57  ;;  %v297_v62 = vadd.f32 1.0, %v1623_v61 }
 0x16d   :  { %418 = vmatprep.mubr.f32.mxu1 %v1905_v5  ;;  %1526 = vmatpush1.bf16.msra.mxu1 %v2109_v48 }
 0x16e   :  { %v305_v1 = vmul.f32 0.5, %v297_v62  ;;  %1528 = vmatprep.subr.bf16.mxu1 %v2113_v54 }
 0x16f   :  { %v1625_v2 = vpop.eup %1624 }
 0x170   :  { %419 = vmatmul.mubr.f32.gmra.mrb[12].mxu1 %v305_v1  ;;  %v298_v6 = vadd.f32 1.0, %v1625_v2 }
 0x171   :  { %424 = vmatprep.mubr.f32.mxu1 %v1905_v5  ;;  %1530 = vmatpush1.bf16.msra.mxu1 %v2115_v58 }
 0x172   :  { %v306_v10 = vmul.f32 0.5, %v298_v6  ;;  %1532 = vmatprep.subr.bf16.mxu1 %v2119_v0 }
 0x174   :  { %425 = vmatmul.mubr.f32.gmra.mrb[14].mxu1 %v306_v10 }
 0x175   :  { %1534 = vmatpush1.bf16.msra.mxu1 %v2121_v4  ;;  %696 = vmatprep.mubr.f32.mxu1 %v1905_v5 }
 0x176   :  { %1568 = vmatprep.subr.bf16.mxu1 %v2043_v41 }
 0x22b   :  { %v384_v22 = vpop.f32.mrb[0].mxu1 }
 0x22c   :  { %v385_v23 = vadd.f32 %v384_v22, %v2167_v18  ;;  %v386_v25 = vpop.f32.mrb[1].mxu1 }
 0x22d   :  { %v387_v28 = vadd.f32 %v386_v25, %v2169_v21 }
 0x22e   :  { %v431_v30 = vmul.f32 0.5, %v385_v23 }
 0x22f   :  { %v432_v41 = vmul.f32 0.5, %v387_v28  ;;  %v390_v31 = vpop.f32.mrb[2].mxu1 }
 0x230   :  { %1626 = vtanh.f32 %v431_v30  ;;  %v391_v33 = vadd.f32 %v390_v31, %v2167_v18  ;;  %v392_v3 = vpop.f32.mrb[3].mxu1 }
 0x231   :  { %1628 = vtanh.f32 %v432_v41  ;;  %v393_v36 = vadd.f32 %v392_v3, %v2169_v21 }
 0x232   :  { %v433_v37 = vmul.f32 0.5, %v391_v33 }
 0x233   :  { %v434_v39 = vmul.f32 0.5, %v393_v36  ;;  %v396_v42 = vpop.f32.mrb[4].mxu1 }
 0x234   :  { %1630 = vtanh.f32 %v433_v37  ;;  %v397_v44 = vadd.f32 %v396_v42, %v2167_v18  ;;  %v398_v47 = vpop.f32.mrb[5].mxu1 }
 0x235   :  { %1632 = vtanh.f32 %v434_v39  ;;  %v399_v49 = vadd.f32 %v398_v47, %v2169_v21 }
 0x236   :  { %v435_v50 = vmul.f32 0.5, %v397_v44 }
 0x237   :  { %v436_v55 = vmul.f32 0.5, %v399_v49  ;;  %v402_v57 = vpop.f32.mrb[6].mxu1 }
 0x238   :  { %1634 = vtanh.f32 %v435_v50  ;;  %v403_v61 = vadd.f32 %v402_v57, %v2167_v18  ;;  %v404_v62 = vpop.f32.mrb[7].mxu1 }
 0x239   :  { %1636 = vtanh.f32 %v436_v55  ;;  %v405_v1 = vadd.f32 %v404_v62, %v2169_v21 }
 0x23a   :  { %v1627_v2 = vpop.eup %1626  ;;  %v437_v6 = vmul.f32 0.5, %v403_v61 }
 0x23b   :  { %v1629_v10 = vpop.eup %1628  ;;  %v463_v11 = vadd.f32 1.0, %v1627_v2  ;;  %v438_v12 = vmul.f32 0.5, %v405_v1  ;;  %v408_v15 = vpop.f32.mrb[8].mxu1 }
 0x23c   :  { %v464_v16 = vadd.f32 1.0, %v1629_v10  ;;  %1638 = vtanh.f32 %v437_v6  ;;  %v409_v17 = vadd.f32 %v408_v15, %v2167_v18  ;;  %v410_v22 = vpop.f32.mrb[9].mxu1 }
 0x23d   :  { %1640 = vtanh.f32 %v438_v12  ;;  %v411_v23 = vadd.f32 %v410_v22, %v2169_v21  ;;  %v479_v31 = vmul.f32 0.5, %v463_v11 }
 0x23e   :  { %v1631_v25 = vpop.eup %1630  ;;  %v439_v28 = vmul.f32 0.5, %v409_v17  ;;  %v480_v30 = vmul.f32 0.5, %v464_v16 }
 0x23f   :  { %v1633_v41 = vpop.eup %1632  ;;  %v465_v33 = vadd.f32 1.0, %v1631_v25  ;;  %v440_v3 = vmul.f32 0.5, %v411_v23  ;;  %v414_v36 = vpop.f32.mrb[10].mxu1 }
 0x240   :  { %v466_v37 = vadd.f32 1.0, %v1633_v41  ;;  %1642 = vtanh.f32 %v439_v28  ;;  %v415_v39 = vadd.f32 %v414_v36, %v2167_v18  ;;  %v416_v42 = vpop.f32.mrb[11].mxu1  ;;  %559 = vmatprep.mubr.f32.mxu0 %v480_v30 }
 0x241   :  { %1644 = vtanh.f32 %v440_v3  ;;  %v417_v44 = vadd.f32 %v416_v42, %v2169_v21  ;;  %560 = vmatmul.mubr.f32.vlgmr.msra.gmra.mrb[16].mxu0 %v479_v31  ;;  %v481_v1 = vmul.f32 0.5, %v465_v33 }
 0x242   :  { %v1635_v47 = vpop.eup %1634  ;;  %v441_v49 = vmul.f32 0.5, %v415_v39  ;;  %v482_v50 = vmul.f32 0.5, %v466_v37  ;;  %1538 = vmatpush3.bf16.msra.mxu0 %v2014_v7 }
 0x243   :  { %v1637_v55 = vpop.eup %1636  ;;  %v467_v57 = vadd.f32 1.0, %v1635_v47  ;;  %v442_v61 = vmul.f32 0.5, %v417_v44  ;;  %v420_v62 = vpop.f32.mrb[12].mxu1  ;;  %1540 = vmatprep.subr.bf16.mxu0 %v2016_v8 }
 0x244   :  { %v468_v2 = vadd.f32 1.0, %v1637_v55  ;;  %1646 = vtanh.f32 %v441_v49  ;;  %v421_v6 = vadd.f32 %v420_v62, %v2167_v18  ;;  %v422_v10 = vpop.f32.mrb[13].mxu1  ;;  %564 = vmatprep.mubr.f32.mxu0 %v482_v50 }
 0x245   :  { %1648 = vtanh.f32 %v442_v61  ;;  %v423_v11 = vadd.f32 %v422_v10, %v2169_v21  ;;  %565 = vmatmul.mubr.f32.gmra.mrb[18].mxu0 %v481_v1  ;;  %v483_v8 = vmul.f32 0.5, %v467_v57 }
 0x246   :  { %v1639_v12 = vpop.eup %1638  ;;  %v443_v15 = vmul.f32 0.5, %v421_v6  ;;  %v484_v7 = vmul.f32 0.5, %v468_v2  ;;  %1542 = vmatpush3.bf16.msra.mxu0 %v2020_v13 }
 0x247   :  { %v1641_v16 = vpop.eup %1640  ;;  %v469_v17 = vadd.f32 1.0, %v1639_v12  ;;  %v444_v22 = vmul.f32 0.5, %v423_v11  ;;  %v426_v23 = vpop.f32.mrb[14].mxu1  ;;  %1544 = vmatprep.subr.bf16.mxu0 %v2023_v14 }
 0x248   :  { %v470_v25 = vadd.f32 1.0, %v1641_v16  ;;  %1650 = vtanh.f32 %v443_v15  ;;  %v427_v28 = vadd.f32 %v426_v23, %v2167_v18  ;;  %v428_v30 = vpop.f32.mrb[15].mxu1  ;;  %569 = vmatprep.mubr.f32.mxu0 %v484_v7 }
 0x249   :  { %1652 = vtanh.f32 %v444_v22  ;;  %v429_v41 = vadd.f32 %v428_v30, %v2169_v21  ;;  %570 = vmatmul.mubr.f32.gmra.mrb[20].mxu0 %v483_v8  ;;  %v485_v39 = vmul.f32 0.5, %v469_v17 }
 0x24a   :  { %v1643_v31 = vpop.eup %1642  ;;  %v445_v33 = vmul.f32 0.5, %v427_v28  ;;  %v486_v13 = vmul.f32 0.5, %v470_v25  ;;  %1546 = vmatpush3.bf16.msra.mxu0 %v2026_v19 }
 0x24b   :  { %v1645_v3 = vpop.eup %1644  ;;  %v471_v36 = vadd.f32 1.0, %v1643_v31  ;;  %v446_v37 = vmul.f32 0.5, %v429_v41  ;;  %1548 = vmatprep.subr.bf16.mxu0 %v2029_v20 }
 0x24c   :  { %v472_v14 = vadd.f32 1.0, %v1645_v3  ;;  %1654 = vtanh.f32 %v445_v33  ;;  %574 = vmatprep.mubr.f32.mxu0 %v486_v13 }
 0x24d   :  { %1656 = vtanh.f32 %v446_v37  ;;  %575 = vmatmul.mubr.f32.gmra.mrb[22].mxu0 %v485_v39  ;;  %v487_v50 = vmul.f32 0.5, %v471_v36 }
 0x24e   :  { %v1647_v42 = vpop.eup %1646  ;;  %v488_v44 = vmul.f32 0.5, %v472_v14  ;;  %1550 = vmatpush3.bf16.msra.mxu0 %v2032_v26 }
 0x24f   :  { %v1649_v47 = vpop.eup %1648  ;;  %v473_v49 = vadd.f32 1.0, %v1647_v42  ;;  %1552 = vmatprep.subr.bf16.mxu0 %v2035_v27 }
 0x250   :  { %v474_v19 = vadd.f32 1.0, %v1649_v47  ;;  %579 = vmatprep.mubr.f32.mxu0 %v488_v44 }
 0x251   :  { %580 = vmatmul.mubr.f32.gmra.mrb[24].mxu0 %v487_v50  ;;  %v489_v62 = vmul.f32 0.5, %v473_v49 }
 0x252   :  { %v1651_v55 = vpop.eup %1650  ;;  %v490_v57 = vmul.f32 0.5, %v474_v19  ;;  %1554 = vmatpush3.bf16.msra.mxu0 %v2038_v34 }
 0x253   :  { %v1653_v20 = vpop.eup %1652  ;;  %v475_v61 = vadd.f32 1.0, %v1651_v55  ;;  %1556 = vmatprep.subr.bf16.mxu0 %v2041_v40 }
 0x254   :  { %v476_v1 = vadd.f32 1.0, %v1653_v20  ;;  %584 = vmatprep.mubr.f32.mxu0 %v490_v57 }
 0x255   :  { %585 = vmatmul.mubr.f32.gmra.mrb[26].mxu0 %v489_v62  ;;  %v491_v10 = vmul.f32 0.5, %v475_v61 }
 0x256   :  { %v1655_v26 = vpop.eup %1654  ;;  %v492_v2 = vmul.f32 0.5, %v476_v1  ;;  %1558 = vmatpush3.bf16.msra.mxu0 %v2051_v51 }
 0x257   :  { %v1657_v27 = vpop.eup %1656  ;;  %v477_v6 = vadd.f32 1.0, %v1655_v26  ;;  %1560 = vmatprep.subr.bf16.mxu0 %v2057_v53 }
 0x258   :  { %v478_v11 = vadd.f32 1.0, %v1657_v27  ;;  %589 = vmatprep.mubr.f32.mxu0 %v492_v2 }
 0x259   :  { %590 = vmatmul.mubr.f32.gmra.mrb[28].mxu0 %v491_v10  ;;  %v493_v12 = vmul.f32 0.5, %v477_v6 }
 0x25a   :  { %v494_v34 = vmul.f32 0.5, %v478_v11  ;;  %1562 = vmatpush3.bf16.msra.mxu0 %v2063_v59 }
 0x25b   :  { %1564 = vmatprep.subr.bf16.mxu0 %v2067_v60 }
 0x25c   :  { %594 = vmatprep.mubr.f32.mxu0 %v494_v34 }
 0x25d   :  { %595 = vmatmul.mubr.f32.gmra.mrb[30].mxu0 %v493_v12 }
 0x25e   :  { %1566 = vmatpush3.bf16.msra.mxu0 %v2071_v63 }
 0x314   :  { %v1327_v40 = vpop.f32.mrb[16].mxu0 }
 0x315   :  { %v1328_v51 = vpop.f32.mrb[17].mxu0 }
 0x316   :  { %v1329_v15 = vadd.f32 %v1328_v51, %v1327_v40 }
 0x318   :  { %v562_v7 = vadd.f32 %v1329_v15, %v2130_v9  ;;  %v1330_v16 = vpop.f32.mrb[18].mxu0 }
 0x319   :  { %v1331_v53 = vpop.f32.mrb[19].mxu0 }
 0x31a   :  { %v600_v17 = vmul.f32 0.5, %v562_v7  ;;  %v1332_v22 = vadd.f32 %v1331_v53, %v1330_v16 }
 0x31c   :  { %1658 = vtanh.f32 %v600_v17  ;;  %v567_v23 = vadd.f32 %v1332_v22, %v2130_v9  ;;  %v1333_v59 = vpop.f32.mrb[20].mxu0 }
 0x31d   :  { %v1334_v8 = vpop.f32.mrb[21].mxu0 }
 0x31e   :  { %v601_v25 = vmul.f32 0.5, %v567_v23  ;;  %v1335_v60 = vadd.f32 %v1334_v8, %v1333_v59 }
 0x320   :  { %1660 = vtanh.f32 %v601_v25  ;;  %v572_v28 = vadd.f32 %v1335_v60, %v2130_v9  ;;  %v1336_v63 = vpop.f32.mrb[22].mxu0 }
 0x321   :  { %v1337_v30 = vpop.f32.mrb[23].mxu0 }
 0x322   :  { %v602_v41 = vmul.f32 0.5, %v572_v28  ;;  %v1338_v31 = vadd.f32 %v1337_v30, %v1336_v63 }
 0x324   :  { %1662 = vtanh.f32 %v602_v41  ;;  %v577_v33 = vadd.f32 %v1338_v31, %v2130_v9  ;;  %v1339_v13 = vpop.f32.mrb[24].mxu0 }
 0x325   :  { %v1340_v3 = vpop.f32.mrb[25].mxu0 }
 0x326   :  { %v1659_v36 = vpop.eup %1658  ;;  %v603_v37 = vmul.f32 0.5, %v577_v33  ;;  %v1341_v39 = vadd.f32 %v1340_v3, %v1339_v13 }
 0x327   :  { %v616_v14 = vadd.f32 1.0, %v1659_v36 }
 0x328   :  { %1664 = vtanh.f32 %v603_v37  ;;  %v582_v42 = vadd.f32 %v1341_v39, %v2130_v9  ;;  %v1342_v44 = vpop.f32.mrb[26].mxu0 }
 0x329   :  { %v624_v47 = vmul.f32 0.5, %v616_v14  ;;  %v1343_v49 = vpop.f32.mrb[27].mxu0 }
 0x32a   :  { %v1661_v50 = vpop.eup %1660  ;;  %v604_v19 = vmul.f32 0.5, %v582_v42  ;;  %v1344_v55 = vadd.f32 %v1343_v49, %v1342_v44 }
 0x32b   :  { %697 = vmatmul.mubr.f32.vlgmr.msra.gmra.mrb[16].mxu1 %v624_v47  ;;  %v617_v57 = vadd.f32 1.0, %v1661_v50 }
 0x32c   :  { %1666 = vtanh.f32 %v604_v19  ;;  %v587_v20 = vadd.f32 %v1344_v55, %v2130_v9  ;;  %v1345_v61 = vpop.f32.mrb[28].mxu0  ;;  %702 = vmatprep.mubr.f32.mxu1 %v1905_v5  ;;  %1570 = vmatpush1.bf16.msra.mxu1 %v2045_v45 }
 0x32d   :  { %v1346_v62 = vpop.f32.mrb[29].mxu0  ;;  %v625_v1 = vmul.f32 0.5, %v617_v57  ;;  %1572 = vmatprep.subr.bf16.mxu1 %v2047_v46 }
 0x32e   :  { %v1663_v26 = vpop.eup %1662  ;;  %v605_v2 = vmul.f32 0.5, %v587_v20  ;;  %v1347_v27 = vadd.f32 %v1346_v62, %v1345_v61 }
 0x32f   :  { %703 = vmatmul.mubr.f32.gmra.mrb[18].mxu1 %v625_v1  ;;  %v618_v6 = vadd.f32 1.0, %v1663_v26 }
 0x330   :  { %1668 = vtanh.f32 %v605_v2  ;;  %v592_v10 = vadd.f32 %v1347_v27, %v2130_v9  ;;  %v1348_v11 = vpop.f32.mrb[30].mxu0  ;;  %708 = vmatprep.mubr.f32.mxu1 %v1905_v5  ;;  %1574 = vmatpush1.bf16.msra.mxu1 %v2054_v52 }
 0x331   :  { %v1349_v34 = vpop.f32.mrb[31].mxu0  ;;  %v626_v12 = vmul.f32 0.5, %v618_v6  ;;  %1576 = vmatprep.subr.bf16.mxu1 %v2060_v56 }
 0x332   :  { %v1665_v45 = vpop.eup %1664  ;;  %v606_v40 = vmul.f32 0.5, %v592_v10  ;;  %v1350_v46 = vadd.f32 %v1349_v34, %v1348_v11 }
 0x333   :  { %709 = vmatmul.mubr.f32.gmra.mrb[20].mxu1 %v626_v12  ;;  %v619_v51 = vadd.f32 1.0, %v1665_v45 }
 0x334   :  { %1670 = vtanh.f32 %v606_v40  ;;  %v597_v15 = vadd.f32 %v1350_v46, %v2130_v9  ;;  %714 = vmatprep.mubr.f32.mxu1 %v1905_v5  ;;  %1578 = vmatpush1.bf16.msra.mxu1 %v2092_v24 }
 0x335   :  { %v627_v7 = vmul.f32 0.5, %v619_v51  ;;  %1580 = vmatprep.subr.bf16.mxu1 %v2095_v29 }
 0x336   :  { %v1667_v52 = vpop.eup %1666  ;;  %v607_v16 = vmul.f32 0.5, %v597_v15 }
 0x337   :  { %715 = vmatmul.mubr.f32.gmra.mrb[22].mxu1 %v627_v7  ;;  %v620_v53 = vadd.f32 1.0, %v1667_v52 }
 0x338   :  { %1672 = vtanh.f32 %v607_v16  ;;  %720 = vmatprep.mubr.f32.mxu1 %v1905_v5  ;;  %1582 = vmatpush1.bf16.msra.mxu1 %v2097_v32 }
 0x339   :  { %v628_v56 = vmul.f32 0.5, %v620_v53  ;;  %1584 = vmatprep.subr.bf16.mxu1 %v2101_v35 }
 0x33a   :  { %v1669_v17 = vpop.eup %1668 }
 0x33b   :  { %721 = vmatmul.mubr.f32.gmra.mrb[24].mxu1 %v628_v56  ;;  %v621_v22 = vadd.f32 1.0, %v1669_v17 }
 0x33c   :  { %726 = vmatprep.mubr.f32.mxu1 %v1905_v5  ;;  %1586 = vmatpush1.bf16.msra.mxu1 %v2103_v38 }
 0x33d   :  { %v629_v24 = vmul.f32 0.5, %v621_v22  ;;  %1588 = vmatprep.subr.bf16.mxu1 %v2107_v43 }
 0x33e   :  { %v1671_v29 = vpop.eup %1670 }
 0x33f   :  { %727 = vmatmul.mubr.f32.gmra.mrb[26].mxu1 %v629_v24  ;;  %v622_v23 = vadd.f32 1.0, %v1671_v29 }
 0x340   :  { %732 = vmatprep.mubr.f32.mxu1 %v1905_v5  ;;  %1590 = vmatpush1.bf16.msra.mxu1 %v2109_v48 }
 0x341   :  { %v630_v32 = vmul.f32 0.5, %v622_v23  ;;  %1592 = vmatprep.subr.bf16.mxu1 %v2113_v54 }
 0x342   :  { %v1673_v35 = vpop.eup %1672 }
 0x343   :  { %733 = vmatmul.mubr.f32.gmra.mrb[28].mxu1 %v630_v32  ;;  %v623_v59 = vadd.f32 1.0, %v1673_v35 }
 0x344   :  { %738 = vmatprep.mubr.f32.mxu1 %v1905_v5  ;;  %1594 = vmatpush1.bf16.msra.mxu1 %v2115_v58 }
 0x345   :  { %v631_v38 = vmul.f32 0.5, %v623_v59  ;;  %1596 = vmatprep.subr.bf16.mxu1 %v2119_v0 }
 0x347   :  { %739 = vmatmul.mubr.f32.gmra.mrb[30].mxu1 %v631_v38 }
 0x348   :  { %1598 = vmatpush1.bf16.msra.mxu1 %v2121_v4  ;;  %1010 = vmatprep.mubr.f32.mxu1 %v1905_v5 }
 0x3fe   :  { %v698_v43 = vpop.f32.mrb[16].mxu1 }
 0x3ff   :  { %v699_v48 = vadd.f32 %v698_v43, %v2167_v18  ;;  %v700_v8 = vpop.f32.mrb[17].mxu1 }
 0x400   :  { %v701_v54 = vadd.f32 %v700_v8, %v2169_v21 }
 0x401   :  { %v745_v25 = vmul.f32 0.5, %v699_v48 }
 0x402   :  { %v746_v60 = vmul.f32 0.5, %v701_v54  ;;  %v704_v28 = vpop.f32.mrb[18].mxu1 }
 0x403   :  { %1674 = vtanh.f32 %v745_v25  ;;  %v705_v58 = vadd.f32 %v704_v28, %v2167_v18  ;;  %v706_v63 = vpop.f32.mrb[19].mxu1 }
 0x404   :  { %1676 = vtanh.f32 %v746_v60  ;;  %v707_v0 = vadd.f32 %v706_v63, %v2169_v21 }
 0x405   :  { %v747_v30 = vmul.f32 0.5, %v705_v58 }
 0x406   :  { %v748_v4 = vmul.f32 0.5, %v707_v0  ;;  %v710_v41 = vpop.f32.mrb[20].mxu1 }
 0x407   :  { %1678 = vtanh.f32 %v747_v30  ;;  %v711_v31 = vadd.f32 %v710_v41, %v2167_v18  ;;  %v712_v33 = vpop.f32.mrb[21].mxu1 }
 0x408   :  { %1680 = vtanh.f32 %v748_v4  ;;  %v713_v13 = vadd.f32 %v712_v33, %v2169_v21 }
 0x409   :  { %v749_v3 = vmul.f32 0.5, %v711_v31 }
 0x40a   :  { %v750_v36 = vmul.f32 0.5, %v713_v13  ;;  %v716_v37 = vpop.f32.mrb[22].mxu1 }
 0x40b   :  { %1682 = vtanh.f32 %v749_v3  ;;  %v717_v39 = vadd.f32 %v716_v37, %v2167_v18  ;;  %v718_v14 = vpop.f32.mrb[23].mxu1 }
 0x40c   :  { %1684 = vtanh.f32 %v750_v36  ;;  %v719_v42 = vadd.f32 %v718_v14, %v2169_v21 }
 0x40d   :  { %v1675_v44 = vpop.eup %1674  ;;  %v751_v47 = vmul.f32 0.5, %v717_v39 }
 0x40e   :  { %v1677_v49 = vpop.eup %1676  ;;  %v777_v50 = vadd.f32 1.0, %v1675_v44  ;;  %v752_v19 = vmul.f32 0.5, %v719_v42  ;;  %v722_v55 = vpop.f32.mrb[24].mxu1 }
 0x40f   :  { %v778_v57 = vadd.f32 1.0, %v1677_v49  ;;  %1686 = vtanh.f32 %v751_v47  ;;  %v723_v20 = vadd.f32 %v722_v55, %v2167_v18  ;;  %v724_v61 = vpop.f32.mrb[25].mxu1 }
 0x410   :  { %1688 = vtanh.f32 %v752_v19  ;;  %v725_v62 = vadd.f32 %v724_v61, %v2169_v21  ;;  %v793_v6 = vmul.f32 0.5, %v777_v50 }
 0x411   :  { %v1679_v1 = vpop.eup %1678  ;;  %v753_v26 = vmul.f32 0.5, %v723_v20  ;;  %v794_v2 = vmul.f32 0.5, %v778_v57 }
 0x412   :  { %v1681_v27 = vpop.eup %1680  ;;  %v779_v10 = vadd.f32 1.0, %v1679_v1  ;;  %v754_v11 = vmul.f32 0.5, %v725_v62  ;;  %v728_v34 = vpop.f32.mrb[26].mxu1 }
 0x413   :  { %v780_v12 = vadd.f32 1.0, %v1681_v27  ;;  %1690 = vtanh.f32 %v753_v26  ;;  %v729_v45 = vadd.f32 %v728_v34, %v2167_v18  ;;  %v730_v40 = vpop.f32.mrb[27].mxu1  ;;  %873 = vmatprep.mubr.f32.mxu0 %v794_v2 }
 0x414   :  { %1692 = vtanh.f32 %v754_v11  ;;  %v731_v46 = vadd.f32 %v730_v40, %v2169_v21  ;;  %874 = vmatmul.mubr.f32.vlgmr.msra.gmra.mrb[32].mxu0 %v793_v6  ;;  %v795_v17 = vmul.f32 0.5, %v779_v10 }
 0x415   :  { %v1683_v51 = vpop.eup %1682  ;;  %v755_v15 = vmul.f32 0.5, %v729_v45  ;;  %v796_v7 = vmul.f32 0.5, %v780_v12 }
 0x416   :  { %v1685_v52 = vpop.eup %1684  ;;  %v781_v16 = vadd.f32 1.0, %v1683_v51  ;;  %v756_v53 = vmul.f32 0.5, %v731_v46  ;;  %v734_v56 = vpop.f32.mrb[28].mxu1 }
 0x417   :  { %v782_v22 = vadd.f32 1.0, %v1685_v52  ;;  %1694 = vtanh.f32 %v755_v15  ;;  %v735_v24 = vadd.f32 %v734_v56, %v2167_v18  ;;  %v736_v29 = vpop.f32.mrb[29].mxu1  ;;  %878 = vmatprep.mubr.f32.mxu0 %v796_v7 }
 0x418   :  { %1696 = vtanh.f32 %v756_v53  ;;  %v737_v23 = vadd.f32 %v736_v29, %v2169_v21  ;;  %879 = vmatmul.mubr.f32.gmra.mrb[34].mxu0 %v795_v17  ;;  %v797_v54 = vmul.f32 0.5, %v781_v16 }
 0x419   :  { %v1687_v32 = vpop.eup %1686  ;;  %v757_v35 = vmul.f32 0.5, %v735_v24  ;;  %v798_v59 = vmul.f32 0.5, %v782_v22 }
 0x41a   :  { %v1689_v38 = vpop.eup %1688  ;;  %v783_v43 = vadd.f32 1.0, %v1687_v32  ;;  %v758_v48 = vmul.f32 0.5, %v737_v23  ;;  %v740_v8 = vpop.f32.mrb[30].mxu1 }
 0x41b   :  { %v784_v25 = vadd.f32 1.0, %v1689_v38  ;;  %1698 = vtanh.f32 %v757_v35  ;;  %v741_v60 = vadd.f32 %v740_v8, %v2167_v18  ;;  %v742_v28 = vpop.f32.mrb[31].mxu1  ;;  %883 = vmatprep.mubr.f32.mxu0 %v798_v59 }
 0x41c   :  { %1700 = vtanh.f32 %v758_v48  ;;  %v743_v58 = vadd.f32 %v742_v28, %v2169_v21  ;;  %884 = vmatmul.mubr.f32.gmra.mrb[36].mxu0 %v797_v54  ;;  %v799_v33 = vmul.f32 0.5, %v783_v43  ;;  %v1754_v48 = vld [vmem:[%s2336_s4] ss:$0 sm:$0xff]  ;;  %s1906_s4 = smov [#allocation10]  }
 0x41d   :  { %v1691_v63 = vpop.eup %1690  ;;  %v759_v0 = vmul.f32 0.5, %v741_v60  ;;  %v800_v30 = vmul.f32 0.5, %v784_v25  ;;  %s1208_s10 = sshll.u32 %s1906_s4, 4  ;;  %s1209_s10 = int_to_ptr.vmem [resolvable:$true] %s1208_s10 }
 0x41e   :  { %v1693_v4 = vpop.eup %1692  ;;  %v785_v41 = vadd.f32 1.0, %v1691_v63  ;;  %v760_v31 = vmul.f32 0.5, %v743_v58  ;;  %s1843_s15 = scalar_lea.vmem %s1209_s10, 2048  ;;  %p1848_p5 = scmp.lt.s32.totalorder %s1209_s10, %s1209_s10 }
 0x41f   :  { %v786_v13 = vadd.f32 1.0, %v1693_v4  ;;  %1702 = vtanh.f32 %v759_v0  ;;  %888 = vmatprep.mubr.f32.mxu0 %v800_v30  ;;  %p1844_p4 = scmp.ne.s32.totalorder %s1209_s10, %s1843_s15  ;;  %p1849_p6 = scmp.lt.s32.totalorder %s1843_s15, %s1843_s15 }
 0x420   :  { %1704 = vtanh.f32 %v760_v31  ;;  %889 = vmatmul.mubr.f32.gmra.mrb[38].mxu0 %v799_v33  ;;  %v801_v14 = vmul.f32 0.5, %v785_v41 }
 0x421   :  { %v1695_v3 = vpop.eup %1694  ;;  %v802_v36 = vmul.f32 0.5, %v786_v13  ;;  %p1850_p7 = por %p1849_p6, %p1848_p5 }
 0x422   :  { %v1697_v37 = vpop.eup %1696  ;;  %v787_v39 = vadd.f32 1.0, %v1695_v3 }
 0x423   :  { %v788_v42 = vadd.f32 1.0, %v1697_v37  ;;  %893 = vmatprep.mubr.f32.mxu0 %v802_v36  ;;  %p1851_p8 = pnand %p1850_p7, %p1844_p4 }
 0x424   :  { %894 = vmatmul.mubr.f32.gmra.mrb[40].mxu0 %v801_v14  ;;  %v803_v19 = vmul.f32 0.5, %v787_v39 }
 0x425   :  { %v1699_v44 = vpop.eup %1698  ;;  %v804_v47 = vmul.f32 0.5, %v788_v42 }
 0x426   :  { %v1701_v49 = vpop.eup %1700  ;;  %v789_v50 = vadd.f32 1.0, %v1699_v44 }
 0x427   :  { %v790_v55 = vadd.f32 1.0, %v1701_v49  ;;  %898 = vmatprep.mubr.f32.mxu0 %v804_v47 }
 0x428   :  { %899 = vmatmul.mubr.f32.gmra.mrb[42].mxu0 %v803_v19  ;;  %v805_v1 = vmul.f32 0.5, %v789_v50 }
 0x429   :  { %v1703_v57 = vpop.eup %1702  ;;  %v806_v20 = vmul.f32 0.5, %v790_v55 }
 0x42a   :  { %v1705_v61 = vpop.eup %1704  ;;  %v791_v62 = vadd.f32 1.0, %v1703_v57 }
 0x42b   :  { %v792_v26 = vadd.f32 1.0, %v1705_v61  ;;  %903 = vmatprep.mubr.f32.mxu0 %v806_v20 }
 0x42c   :  { %904 = vmatmul.mubr.f32.gmra.mrb[44].mxu0 %v805_v1  ;;  %v807_v27 = vmul.f32 0.5, %v791_v62 }
 0x42d   :  { %v808_v2 = vmul.f32 0.5, %v792_v26 }
 0x42f   :  { %908 = vmatprep.mubr.f32.mxu0 %v808_v2 }
 0x430   :  { %909 = vmatmul.mubr.f32.gmra.mrb[46].mxu0 %v807_v27 }
 0x4e7   :  { %v1383_v6 = vpop.f32.mrb[32].mxu0 }
 0x4e8   :  { %v1384_v10 = vpop.f32.mrb[33].mxu0 }
 0x4e9   :  { %v1385_v11 = vadd.f32 %v1384_v10, %v1383_v6 }
 0x4eb   :  { %v876_v34 = vadd.f32 %v1385_v11, %v2130_v9  ;;  %v1386_v12 = vpop.f32.mrb[34].mxu0 }
 0x4ec   :  { %v1387_v45 = vpop.f32.mrb[35].mxu0 }
 0x4ed   :  { %v914_v40 = vmul.f32 0.5, %v876_v34  ;;  %v1388_v46 = vadd.f32 %v1387_v45, %v1386_v12 }
 0x4ef   :  { %1706 = vtanh.f32 %v914_v40  ;;  %v881_v51 = vadd.f32 %v1388_v46, %v2130_v9  ;;  %v1389_v15 = vpop.f32.mrb[36].mxu0 }
 0x4f0   :  { %v1390_v7 = vpop.f32.mrb[37].mxu0 }
 0x4f1   :  { %v915_v52 = vmul.f32 0.5, %v881_v51  ;;  %v1391_v16 = vadd.f32 %v1390_v7, %v1389_v15 }
 0x4f3   :  { %1708 = vtanh.f32 %v915_v52  ;;  %v886_v53 = vadd.f32 %v1391_v16, %v2130_v9  ;;  %v1392_v56 = vpop.f32.mrb[38].mxu0 }
 0x4f4   :  { %v1393_v17 = vpop.f32.mrb[39].mxu0 }
 0x4f5   :  { %v916_v22 = vmul.f32 0.5, %v886_v53  ;;  %v1394_v24 = vadd.f32 %v1393_v17, %v1392_v56 }
 0x4f7   :  { %1710 = vtanh.f32 %v916_v22  ;;  %v891_v29 = vadd.f32 %v1394_v24, %v2130_v9  ;;  %v1395_v23 = vpop.f32.mrb[40].mxu0 }
 0x4f8   :  { %v1396_v32 = vpop.f32.mrb[41].mxu0 }
 0x4f9   :  { %v1707_v35 = vpop.eup %1706  ;;  %v917_v59 = vmul.f32 0.5, %v891_v29  ;;  %v1397_v38 = vadd.f32 %v1396_v32, %v1395_v23 }
 0x4fa   :  { %v930_v43 = vadd.f32 1.0, %v1707_v35 }
 0x4fb   :  { %1712 = vtanh.f32 %v917_v59  ;;  %v896_v8 = vadd.f32 %v1754_v48, %v1397_v38  ;;  %v1398_v54 = vpop.f32.mrb[42].mxu0 }
 0x4fc   :  { %v938_v25 = vmul.f32 0.5, %v930_v43  ;;  %v1399_v60 = vpop.f32.mrb[43].mxu0 }
 0x4fd   :  { %v1709_v28 = vpop.eup %1708  ;;  %v918_v58 = vmul.f32 0.5, %v896_v8  ;;  %v1400_v63 = vadd.f32 %v1399_v60, %v1398_v54 }
 0x4fe   :  { %1011 = vmatmul.mubr.f32.vlgmr.msra.gmra.mrb[32].mxu1 %v938_v25  ;;  %v931_v9 = vadd.f32 1.0, %v1709_v28 }
 0x4ff   :  { %1714 = vtanh.f32 %v918_v58  ;;  %v901_v0 = vadd.f32 %v1754_v48, %v1400_v63  ;;  %v1401_v30 = vpop.f32.mrb[44].mxu0  ;;  %1016 = vmatprep.mubr.f32.mxu1 %v1905_v5  ;;  %v1123_v63 = vld [vmem:[#allocation5] sm:$0xff] }
 0x500   :  { %v1402_v4 = vpop.f32.mrb[45].mxu0  ;;  %v939_v41 = vmul.f32 0.5, %v931_v9 }
 0x501   :  { %v1711_v31 = vpop.eup %1710  ;;  %v919_v33 = vmul.f32 0.5, %v901_v0  ;;  %v1403_v13 = vadd.f32 %v1402_v4, %v1401_v30 }
 0x502   :  { %1017 = vmatmul.mubr.f32.gmra.mrb[34].mxu1 %v939_v41  ;;  %v932_v3 = vadd.f32 1.0, %v1711_v31  ;;  %v1124_v41 = vld [vmem:[#allocation5 + $0x8] sm:$0xff] }
 0x503   :  { %1716 = vtanh.f32 %v919_v33  ;;  %v906_v36 = vadd.f32 %v1754_v48, %v1403_v13  ;;  %v1404_v37 = vpop.f32.mrb[46].mxu0  ;;  %1022 = vmatprep.mubr.f32.mxu1 %v1905_v5 }
 0x504   :  { %v1405_v39 = vpop.f32.mrb[47].mxu0  ;;  %v940_v14 = vmul.f32 0.5, %v932_v3 }
 0x505   :  { %v1713_v42 = vpop.eup %1712  ;;  %v920_v44 = vmul.f32 0.5, %v906_v36  ;;  %v1406_v47 = vadd.f32 %v1405_v39, %v1404_v37 }
 0x506   :  { %1023 = vmatmul.mubr.f32.gmra.mrb[36].mxu1 %v940_v14  ;;  %v933_v49 = vadd.f32 1.0, %v1713_v42 }
 0x507   :  { %1718 = vtanh.f32 %v920_v44  ;;  %v911_v50 = vadd.f32 %v1754_v48, %v1406_v47  ;;  %1028 = vmatprep.mubr.f32.mxu1 %v1905_v5  ;;  %v1125_v44 = vld [vmem:[#allocation5 + $0x10] sm:$0xff] }
 0x508   :  { %v941_v19 = vmul.f32 0.5, %v933_v49 }
 0x509   :  { %v1715_v55 = vpop.eup %1714  ;;  %v921_v57 = vmul.f32 0.5, %v911_v50 }
 0x50a   :  { %1029 = vmatmul.mubr.f32.gmra.mrb[38].mxu1 %v941_v19  ;;  %v934_v20 = vadd.f32 1.0, %v1715_v55  ;;  %v1126_v55 = vld [vmem:[#allocation5 + $0x18] sm:$0xff] }
 0x50b   :  { %1720 = vtanh.f32 %v921_v57  ;;  %1034 = vmatprep.mubr.f32.mxu1 %v1905_v5 }
 0x50c   :  { %v942_v61 = vmul.f32 0.5, %v934_v20 }
 0x50d   :  { %v1717_v62 = vpop.eup %1716 }
 0x50e   :  { %1035 = vmatmul.mubr.f32.gmra.mrb[40].mxu1 %v942_v61  ;;  %v935_v1 = vadd.f32 1.0, %v1717_v62 }
 0x50f   :  { %1040 = vmatprep.mubr.f32.mxu1 %v1905_v5 }
 0x510   :  { %v943_v26 = vmul.f32 0.5, %v935_v1 }
 0x511   :  { %v1719_v2 = vpop.eup %1718 }
 0x512   :  { %1041 = vmatmul.mubr.f32.gmra.mrb[42].mxu1 %v943_v26  ;;  %v936_v27 = vadd.f32 1.0, %v1719_v2 }
 0x513   :  { %1046 = vmatprep.mubr.f32.mxu1 %v1905_v5 }
 0x514   :  { %v944_v6 = vmul.f32 0.5, %v936_v27 }
 0x515   :  { %v1721_v10 = vpop.eup %1720 }
 0x516   :  { %1047 = vmatmul.mubr.f32.gmra.mrb[44].mxu1 %v944_v6  ;;  %v937_v11 = vadd.f32 1.0, %v1721_v10  ;;  %v1127_v10 = vld [vmem:[#allocation5 + $0x20] sm:$0xff] }
 0x517   :  { %1052 = vmatprep.mubr.f32.mxu1 %v1905_v5 }
 0x518   :  { %v945_v34 = vmul.f32 0.5, %v937_v11 }
 0x51a   :  { %1053 = vmatmul.mubr.f32.gmra.mrb[46].mxu1 %v945_v34 }
 0x5d1   :  { %v1012_v12 = vpop.f32.mrb[32].mxu1 }
 0x5d2   :  { %v1013_v45 = vadd.f32 %v1012_v12, %v2167_v18  ;;  %v1014_v40 = vpop.f32.mrb[33].mxu1 }
 0x5d3   :  { %v1015_v46 = vadd.f32 %v1014_v40, %v2169_v21 }
 0x5d4   :  { %v1059_v51 = vmul.f32 0.5, %v1013_v45 }
 0x5d5   :  { %v1060_v15 = vmul.f32 0.5, %v1015_v46  ;;  %v1018_v7 = vpop.f32.mrb[34].mxu1  ;;  %v1128_v46 = vld [vmem:[#allocation5 + $0x28] sm:$0xff] }
 0x5d6   :  { %1722 = vtanh.f32 %v1059_v51  ;;  %v1019_v52 = vadd.f32 %v1018_v7, %v2167_v18  ;;  %v1020_v16 = vpop.f32.mrb[35].mxu1 }
 0x5d7   :  { %1724 = vtanh.f32 %v1060_v15  ;;  %v1021_v53 = vadd.f32 %v1020_v16, %v2169_v21 }
 0x5d8   :  { %v1061_v56 = vmul.f32 0.5, %v1019_v52 }
 0x5d9   :  { %v1062_v17 = vmul.f32 0.5, %v1021_v53  ;;  %v1024_v22 = vpop.f32.mrb[36].mxu1 }
 0x5da   :  { %1726 = vtanh.f32 %v1061_v56  ;;  %v1025_v24 = vadd.f32 %v1024_v22, %v2167_v18  ;;  %v1026_v29 = vpop.f32.mrb[37].mxu1 }
 0x5db   :  { %1728 = vtanh.f32 %v1062_v17  ;;  %v1027_v23 = vadd.f32 %v1026_v29, %v2169_v21 }
 0x5dc   :  { %v1063_v32 = vmul.f32 0.5, %v1025_v24  ;;  %v1129_v24 = vld [vmem:[#allocation5 + $0x30] sm:$0xff] }
 0x5dd   :  { %v1064_v35 = vmul.f32 0.5, %v1027_v23  ;;  %v1030_v59 = vpop.f32.mrb[38].mxu1 }
 0x5de   :  { %1730 = vtanh.f32 %v1063_v32  ;;  %v1031_v38 = vadd.f32 %v1030_v59, %v2167_v18  ;;  %v1032_v43 = vpop.f32.mrb[39].mxu1 }
 0x5df   :  { %1732 = vtanh.f32 %v1064_v35  ;;  %v1033_v48 = vadd.f32 %v1032_v43, %v2169_v21 }
 0x5e0   :  { %v1723_v8 = vpop.eup %1722  ;;  %v1065_v54 = vmul.f32 0.5, %v1031_v38  ;;  %v1130_v38 = vld [vmem:[#allocation5 + $0x38] sm:$0xff] }
 0x5e1   :  { %v1725_v25 = vpop.eup %1724  ;;  %v1091_v60 = vadd.f32 1.0, %v1723_v8  ;;  %v1066_v28 = vmul.f32 0.5, %v1033_v48  ;;  %v1036_v58 = vpop.f32.mrb[40].mxu1 }
 0x5e2   :  { %v1092_v9 = vadd.f32 1.0, %v1725_v25  ;;  %1734 = vtanh.f32 %v1065_v54  ;;  %v1037_v0 = vadd.f32 %v1036_v58, %v2167_v18  ;;  %v1038_v30 = vpop.f32.mrb[41].mxu1 }
 0x5e3   :  { %v1107_v4 = vmul.f32 0.5, %v1091_v60  ;;  %1736 = vtanh.f32 %v1066_v28  ;;  %v1039_v31 = vadd.f32 %v1038_v30, %v2169_v21 }
 0x5e4   :  { %v1727_v33 = vpop.eup %1726  ;;  %v1108_v13 = vmul.f32 0.5, %v1092_v9  ;;  %v1067_v3 = vmul.f32 0.5, %v1037_v0 }
 0x5e5   :  { %v1729_v36 = vpop.eup %1728  ;;  %vm1139_vm0 = vcmp.gt.f32.partialorder %v1107_v4, %v1123_v63  ;;  %1171 = vst [vmem:[#allocation10] sm:$0xff] %v1107_v4  ;;  %v1093_v37 = vadd.f32 1.0, %v1727_v33  ;;  %v1068_v39 = vmul.f32 0.5, %v1039_v31  ;;  %v1042_v14 = vpop.f32.mrb[42].mxu1  ;;  %v1131_v63 = vld [vmem:[#allocation5 + $0x40] sm:$0xff]  ;;  %v1132_v4 = vld [vmem:[#allocation5 + $0x48] sm:$0xff] }
 0x5e6   :  { %v1155_v42 = vsel %vm1139_vm0, 1.0, %v1905_v5  ;;  %vm1140_vm1 = vcmp.gt.f32.partialorder %v1108_v13, %v1124_v41  ;;  %1172 = vst [vmem:[#allocation10 + $0x8] sm:$0xff] %v1108_v13  ;;  %v1094_v47 = vadd.f32 1.0, %v1729_v36  ;;  %1738 = vtanh.f32 %v1067_v3  ;;  %v1044_v49 = vpop.f32.mrb[43].mxu1  ;;  %v1133_v36 = vld [vmem:[#allocation5 + $0x50] sm:$0xff] }
 0x5e7   :  { %1187 = vst [vmem:[#allocation11] sm:$0xff] %v1155_v42  ;;  %v1156_v50 = vsel %vm1140_vm1, 1.0, %v1905_v5  ;;  %v1109_v19 = vmul.f32 0.5, %v1093_v37  ;;  %1740 = vtanh.f32 %v1068_v39  ;;  %v1043_v57 = vadd.f32 %v1042_v14, %v2167_v18  ;;  %v1134_v14 = vld [vmem:[#allocation5 + $0x58] sm:$0xff] }
 0x5e8   :  { %v1731_v20 = vpop.eup %1730  ;;  %1188 = vst [vmem:[#allocation11 + $0x8] sm:$0xff] %v1156_v50  ;;  %v1110_v61 = vmul.f32 0.5, %v1094_v47  ;;  %v1045_v62 = vadd.f32 %v1044_v49, %v2169_v21 }
 0x5e9   :  { %v1733_v1 = vpop.eup %1732  ;;  %vm1141_vm2 = vcmp.gt.f32.partialorder %v1109_v19, %v1125_v44  ;;  %1173 = vst [vmem:[#allocation10 + $0x10] sm:$0xff] %v1109_v19  ;;  %v1095_v26 = vadd.f32 1.0, %v1731_v20  ;;  %v1069_v2 = vmul.f32 0.5, %v1043_v57  ;;  %v1048_v27 = vpop.f32.mrb[44].mxu1  ;;  %v1135_v19 = vld [vmem:[#allocation5 + $0x60] sm:$0xff] }
 0x5ea   :  { %v1157_v6 = vsel %vm1141_vm2, 1.0, %v1905_v5  ;;  %vm1142_vm3 = vcmp.gt.f32.partialorder %v1110_v61, %v1126_v55  ;;  %1174 = vst [vmem:[#allocation10 + $0x18] sm:$0xff] %v1110_v61  ;;  %v1096_v11 = vadd.f32 1.0, %v1733_v1  ;;  %v1070_v34 = vmul.f32 0.5, %v1045_v62  ;;  %v1050_v12 = vpop.f32.mrb[45].mxu1  ;;  %v1136_v61 = vld [vmem:[#allocation5 + $0x68] sm:$0xff] }
 0x5eb   :  { %1189 = vst [vmem:[#allocation11 + $0x10] sm:$0xff] %v1157_v6  ;;  %v1158_v45 = vsel %vm1142_vm3, 1.0, %v1905_v5  ;;  %v1111_v40 = vmul.f32 0.5, %v1095_v26  ;;  %1742 = vtanh.f32 %v1069_v2  ;;  %v1049_v51 = vadd.f32 %v1048_v27, %v2167_v18  ;;  %v1137_v6 = vld [vmem:[#allocation5 + $0x70] sm:$0xff] }
 0x5ec   :  { %v1735_v15 = vpop.eup %1734  ;;  %1190 = vst [vmem:[#allocation11 + $0x18] sm:$0xff] %v1158_v45  ;;  %v1112_v7 = vmul.f32 0.5, %v1096_v11  ;;  %1744 = vtanh.f32 %v1070_v34  ;;  %v1051_v52 = vadd.f32 %v1050_v12, %v2169_v21  ;;  %v1138_v12 = vld [vmem:[#allocation5 + $0x78] sm:$0xff] }
 0x5ed   :  { %v1737_v16 = vpop.eup %1736  ;;  %vm1143_vm4 = vcmp.gt.f32.partialorder %v1111_v40, %v1127_v10  ;;  %1175 = vst [vmem:[#allocation10 + $0x20] sm:$0xff] %v1111_v40  ;;  %v1097_v53 = vadd.f32 1.0, %v1735_v15  ;;  %v1071_v56 = vmul.f32 0.5, %v1049_v51  ;;  %v1054_v17 = vpop.f32.mrb[46].mxu1 }
 0x5ee   :  { %v1159_v22 = vsel %vm1143_vm4, 1.0, %v1905_v5  ;;  %vm1144_vm5 = vcmp.gt.f32.partialorder %v1112_v7, %v1128_v46  ;;  %1176 = vst [vmem:[#allocation10 + $0x28] sm:$0xff] %v1112_v7  ;;  %v1098_v29 = vadd.f32 1.0, %v1737_v16  ;;  %v1072_v23 = vmul.f32 0.5, %v1051_v52  ;;  %v1056_v32 = vpop.f32.mrb[47].mxu1 }
 0x5ef   :  { %1191 = vst [vmem:[#allocation11 + $0x20] sm:$0xff] %v1159_v22  ;;  %v1160_v35 = vsel %vm1144_vm5, 1.0, %v1905_v5  ;;  %v1113_v59 = vmul.f32 0.5, %v1097_v53  ;;  %1746 = vtanh.f32 %v1071_v56  ;;  %v1055_v43 = vadd.f32 %v1054_v17, %v2167_v18 }
 0x5f0   :  { %v1739_v48 = vpop.eup %1738  ;;  %1192 = vst [vmem:[#allocation11 + $0x28] sm:$0xff] %v1160_v35  ;;  %v1114_v8 = vmul.f32 0.5, %v1098_v29  ;;  %1748 = vtanh.f32 %v1072_v23  ;;  %v1057_v54 = vadd.f32 %v1056_v32, %v2169_v21 }
 0x5f1   :  { %v1741_v25 = vpop.eup %1740  ;;  %vm1145_vm6 = vcmp.gt.f32.partialorder %v1113_v59, %v1129_v24  ;;  %1177 = vst [vmem:[#allocation10 + $0x30] sm:$0xff] %v1113_v59  ;;  %v1099_v60 = vadd.f32 1.0, %v1739_v48  ;;  %v1073_v28 = vmul.f32 0.5, %v1055_v43 }
 0x5f2   :  { %v1161_v58 = vsel %vm1145_vm6, 1.0, %v1905_v5  ;;  %vm1146_vm7 = vcmp.gt.f32.partialorder %v1114_v8, %v1130_v38  ;;  %1178 = vst [vmem:[#allocation10 + $0x38] sm:$0xff] %v1114_v8  ;;  %v1100_v9 = vadd.f32 1.0, %v1741_v25  ;;  %v1074_v0 = vmul.f32 0.5, %v1057_v54 }
 0x5f3   :  { %1193 = vst [vmem:[#allocation11 + $0x30] sm:$0xff] %v1161_v58  ;;  %v1162_v18 = vsel %vm1146_vm7, 1.0, %v1905_v5  ;;  %v1115_v30 = vmul.f32 0.5, %v1099_v60  ;;  %1750 = vtanh.f32 %v1073_v28 }
 0x5f4   :  { %1194 = vst [vmem:[#allocation11 + $0x38] sm:$0xff] %v1162_v18  ;;  %v1116_v21 = vmul.f32 0.5, %v1100_v9  ;;  %1752 = vtanh.f32 %v1074_v0 }
 0x5f5   :  { %v1743_v41 = vpop.eup %1742  ;;  %vm1147_vm8 = vcmp.gt.f32.partialorder %v1115_v30, %v1131_v63  ;;  %1179 = vst [vmem:[#allocation10 + $0x40] sm:$0xff] %v1115_v30 }
 0x5f6   :  { %v1745_v31 = vpop.eup %1744  ;;  %v1163_v33 = vsel %vm1147_vm8, 1.0, %v1905_v5  ;;  %vm1148_vm9 = vcmp.gt.f32.partialorder %v1116_v21, %v1132_v4  ;;  %1180 = vst [vmem:[#allocation10 + $0x48] sm:$0xff] %v1116_v21  ;;  %v1101_v13 = vadd.f32 1.0, %v1743_v41 }
 0x5f7   :  { %1195 = vst [vmem:[#allocation11 + $0x40] sm:$0xff] %v1163_v33  ;;  %v1164_v3 = vsel %vm1148_vm9, 1.0, %v1905_v5  ;;  %v1102_v37 = vadd.f32 1.0, %v1745_v31 }
 0x5f8   :  { %1196 = vst [vmem:[#allocation11 + $0x48] sm:$0xff] %v1164_v3  ;;  %v1117_v39 = vmul.f32 0.5, %v1101_v13 }
 0x5f9   :  { %v1747_v42 = vpop.eup %1746  ;;  %v1118_v44 = vmul.f32 0.5, %v1102_v37 }
 0x5fa   :  { %v1749_v47 = vpop.eup %1748  ;;  %vm1149_vm10 = vcmp.gt.f32.partialorder %v1117_v39, %v1133_v36  ;;  %1181 = vst [vmem:[#allocation10 + $0x50] sm:$0xff] %v1117_v39  ;;  %v1103_v49 = vadd.f32 1.0, %v1747_v42 }
 0x5fb   :  { %v1165_v50 = vsel %vm1149_vm10, 1.0, %v1905_v5  ;;  %vm1150_vm11 = vcmp.gt.f32.partialorder %v1118_v44, %v1134_v14  ;;  %1182 = vst [vmem:[#allocation10 + $0x58] sm:$0xff] %v1118_v44  ;;  %v1104_v55 = vadd.f32 1.0, %v1749_v47 }
 0x5fc   :  { %1197 = vst [vmem:[#allocation11 + $0x50] sm:$0xff] %v1165_v50  ;;  %v1166_v57 = vsel %vm1150_vm11, 1.0, %v1905_v5  ;;  %v1119_v20 = vmul.f32 0.5, %v1103_v49 }
 0x5fd   :  { %v1751_v62 = vpop.eup %1750  ;;  %1198 = vst [vmem:[#allocation11 + $0x58] sm:$0xff] %v1166_v57  ;;  %v1120_v1 = vmul.f32 0.5, %v1104_v55 }
 0x5fe   :  { %v1753_v26 = vpop.eup %1752  ;;  %vm1151_vm12 = vcmp.gt.f32.partialorder %v1119_v20, %v1135_v19  ;;  %1183 = vst [vmem:[#allocation10 + $0x60] sm:$0xff] %v1119_v20  ;;  %v1105_v2 = vadd.f32 1.0, %v1751_v62 }
 0x5ff   :  { %v1167_v27 = vsel %vm1151_vm12, 1.0, %v1905_v5  ;;  %vm1152_vm13 = vcmp.gt.f32.partialorder %v1120_v1, %v1136_v61  ;;  %1184 = vst [vmem:[#allocation10 + $0x68] sm:$0xff] %v1120_v1  ;;  %v1106_v10 = vadd.f32 1.0, %v1753_v26 }
 0x600   :  { %1199 = vst [vmem:[#allocation11 + $0x60] sm:$0xff] %v1167_v27  ;;  %v1168_v11 = vsel %vm1152_vm13, 1.0, %v1905_v5  ;;  %v1121_v34 = vmul.f32 0.5, %v1105_v2 }
 0x601   :  { %1200 = vst [vmem:[#allocation11 + $0x68] sm:$0xff] %v1168_v11  ;;  %v1122_v45 = vmul.f32 0.5, %v1106_v10 }
 0x602   :  { %vm1153_vm14 = vcmp.gt.f32.partialorder %v1121_v34, %v1137_v6  ;;  %1185 = vst [vmem:[#allocation10 + $0x70] sm:$0xff] %v1121_v34 }
 0x603   :  { %v1169_v40 = vsel %vm1153_vm14, 1.0, %v1905_v5  ;;  %vm1154_vm15 = vcmp.gt.f32.partialorder %v1122_v45, %v1138_v12  ;;  %1186 = vst [vmem:[#allocation10 + $0x78] sm:$0xff] %v1122_v45 }
 0x604   :  { %1201 = vst [vmem:[#allocation11 + $0x70] sm:$0xff] %v1169_v40  ;;  %v1170_v46 = vsel %vm1154_vm15, 1.0, %v1905_v5 }
 0x605   :  { %1854 = shalt.err (!%p1851_p8)
}
 0x606   :  { %s1855_s16 = scalar_lea.hbm %s2338_s6, 2048 }
 0x607   :  { %p1856_p9 = scmp.ne.s32.totalorder %s2338_s6, %s1855_s16  ;;  %p1859_p10 = scmp.lt.u32.totalorder %s1855_s16, %s2338_s6 }
 0x609   :  { %p1861_p11 = pnand %p1859_p10, %p1856_p9 }
 0x60b   :  { %1864 = shalt.err (!%p1861_p11)
}
 0x60c   :  { %1214 = dma.vmem_to_hbm [thread:$0]  %s1209_s10, 2048, %s2338_s6, [#allocation4], %s1899_s13, %s1899_s13, %s1900_s14   ;;  %1202 = vst [vmem:[#allocation11 + $0x78] sm:$0xff] %v1170_v46 }
 0x60d   :  { %s1865_s23 = scalar_lea.vmem %s2294_s12, 2048  ;;  %p1870_p13 = scmp.lt.s32.totalorder %s2294_s12, %s2294_s12 }
 0x60e   :  { %p1866_p12 = scmp.ne.s32.totalorder %s2294_s12, %s1865_s23  ;;  %p1871_p0 = scmp.lt.s32.totalorder %s1865_s23, %s1865_s23 }
 0x610   :  { %p1872_p1 = por %p1871_p0, %p1870_p13 }
 0x612   :  { %p1873_p2 = pnand %p1872_p1, %p1866_p12 }
 0x614   :  { %1876 = shalt.err (!%p1873_p2)
}
 0x615   :  { %s1877_s25 = scalar_lea.hbm %s2339_s7, 2048 }
 0x616   :  { %p1878_p3 = scmp.ne.s32.totalorder %s2339_s7, %s1877_s25  ;;  %p1881_p4 = scmp.lt.u32.totalorder %s1877_s25, %s2339_s7 }
 0x618   :  { %p1883_p5 = pnand %p1881_p4, %p1878_p3 }
 0x61a   :  { %1886 = shalt.err (!%p1883_p5)
}
 0x61b   :  { %1226 = dma.vmem_to_hbm [thread:$0]  %s2294_s12, 2048, %s2339_s7, [#allocation12], %s1899_s13, %s1899_s13, %s1900_s14  }
 0x61c   :  { %1893 = dma.done.wait [#allocation4], 2048  }
 0x61d   :  { %1894 = vsyncadd [#allocation4], 4294965248 }
 0x61e   :  { %1895 = dma.done.wait [#allocation12], 2048  }
 0x61f   :  { %1896 = vsyncadd [#allocation12], 4294965248 }
 0x620   :  { %1233 = vsyncpa [#allocation3], 1 }
 0x621   :  { %1234 = vsyncpa [#allocation6], 1 }
 0x622   :  { %1235 = vsyncpa [#allocation9], 1 }
 0x623   :  { %1236 = vsyncpa [#allocation4], 1 }
 0x624   :  { %1237 = vsyncpa [#allocation12], 1 }

</bundles_post_ra>
